<compile_context>
chip_gen: v5e
topology: v5e:2x2
jax: 0.10.0
libtpu: 0.0.40
codegen_flags: <defaults>
</compile_context>

<pallas_src>
import jax
import jax.numpy as jnp
import numpy as np
from jax import lax
from jax.experimental import pallas as pl
from jax.experimental.pallas import tpu as pltpu

# ---- spiking neuron (spikingjelly LIFNode, single step from rest) ----------
# charge: h = v + (x - (v - v_reset)) / tau ; v = v_reset = 0  =>  h = x / tau
# fire:   spike = heaviside(h - v_threshold)  ==  (x >= v_threshold * tau)
TAU = 2.0
V_TH = 1.0
THRESH = V_TH * TAU                       # LIF threshold folded onto the pre-activation

# ---- model hyper-parameters implied by the module ---------------------------
IN_CH, OUT_CH = 1, 1
H = W = 28
HW = H * W                                # 784 flattened image
KS, STRIDE = 3, 2
OH = OW = (H - KS) // STRIDE + 1          # 13
P = OUT_CH * OH * OW                      # 169 flattened conv features
KK = KS * KS                              # 9 conv taps
F_OUT = 40

P_PAD = 256                               # conv-output / linear-K lanes (pad of 169)
N_PAD = 128                               # unmasked 128-lane output stores
BT_CAP = 512                              # max batch rows per grid step


def _round_up(x, m):
    return (x + m - 1) // m * m


def _cdiv(a, b):
    return -(-a // b)


# Static im2col scatter pattern for the conv-as-matmul matrix A:
#   A[(2*oh+di)*W + (2*ow+dj), oh*OW+ow] = bn_scale * conv_w[di, dj]
_ROWS, _COLS, _TAPS = [], [], []
for _di in range(KS):
    for _dj in range(KS):
        for _oh in range(OH):
            for _ow in range(OW):
                _ROWS.append((STRIDE * _oh + _di) * W + (STRIDE * _ow + _dj))
                _COLS.append(_oh * OW + _ow)
                _TAPS.append(_di * KS + _dj)
_ROWS = np.asarray(_ROWS, np.int32)
_COLS = np.asarray(_COLS, np.int32)
_TAPS = np.asarray(_TAPS, np.int32)


def _split_bf16(m):
    """f32 matrix -> (hi, lo) bf16 pair with hi+lo ~= m to ~2^-16 relative."""
    hi = m.astype(jnp.bfloat16)
    lo = (m - hi.astype(jnp.float32)).astype(jnp.bfloat16)
    return hi, lo


def net_fwd_kernel(thr_ref, x_ref, a_hi_ref, a_lo_ref, w_hi_ref, w_lo_ref,
                   b1_ref, out_ref):
    """Fused conv(as matmul)+BN -> LIF -> Linear -> LIF for one batch tile.

    thr_ref  : SMEM (1,) f32          LIF-1 threshold with BN shift folded in
    x_ref    : VMEM (bt, 784) f32     raw flattened images
    a_*_ref  : VMEM (784, 256) bf16   conv-as-matmul matrix, hi/lo bf16 split
    w_*_ref  : VMEM (256, 128) bf16   Linear weight (padded), hi/lo bf16 split
    b1_ref   : VMEM (1, 128) f32      Linear bias (padded)
    out_ref  : VMEM (bt, 128) bf16    output spikes (0/1)
    """
    x = x_ref[...]                                        # (bt, 784) f32
    x_hi = x.astype(jnp.bfloat16)
    x_lo = (x - x_hi.astype(jnp.float32)).astype(jnp.bfloat16)

    # conv(3x3, s2, no-bias) * bn_scale + flatten == x @ A ; three bf16 MXU
    # passes with f32 accumulation reproduce the f32 conv to ~1e-4.
    acc = jnp.dot(x_hi, a_hi_ref[...], preferred_element_type=jnp.float32)
    acc += jnp.dot(x_lo, a_hi_ref[...], preferred_element_type=jnp.float32)
    acc += jnp.dot(x_hi, a_lo_ref[...], preferred_element_type=jnp.float32)

    # LIF #1 (BN shift folded into the threshold).  Padded lanes 169..255 have
    # acc == 0; even if they fire they hit zero rows of w1_pad (inert).
    spike1 = jnp.where(acc >= thr_ref[0], 1.0, 0.0).astype(jnp.bfloat16)

    # Flatten is identity; Linear(169->40) padded to 256x128.  0/1 LHS is
    # exact in bf16; hi/lo weight split keeps f32 weight precision.
    z = jnp.dot(spike1, w_hi_ref[...], preferred_element_type=jnp.float32)
    z += jnp.dot(spike1, w_lo_ref[...], preferred_element_type=jnp.float32)
    z += b1_ref[...]

    # LIF #2.
    out_ref[...] = jnp.where(z >= THRESH, 1.0, 0.0).astype(jnp.bfloat16)


def net_forward(x_nchw, conv_w, bn_scale, bn_shift, w1, b1):
    B = x_nchw.shape[0]

    # Batch tiling: multiple-of-8 rows, >=2 grid steps when B >= 16 (keeps both
    # v7x TensorCores busy and gives DMA/compute overlap), capped at 512 rows.
    b8 = _round_up(max(B, 8), 8)
    n_steps = max(1, _cdiv(b8, BT_CAP))
    if b8 >= 16:
        n_steps = max(n_steps, 2)
    bt = _round_up(_cdiv(b8, n_steps), 8)
    b_pad = _round_up(b8, bt)

    x2d = x_nchw.reshape(B, IN_CH * HW).astype(jnp.float32)   # free reshape
    if b_pad != B:
        x2d = jnp.pad(x2d, ((0, b_pad - B), (0, 0)))          # small when B%8==0

    # Fold eval-mode BatchNorm: scale into the conv-as-matmul matrix A,
    # shift into the LIF-1 threshold (keeps compare direction correct).
    taps = (conv_w.reshape(KK) * bn_scale.reshape(())).astype(jnp.float32)
    a_full = jnp.zeros((HW, P_PAD), jnp.float32).at[_ROWS, _COLS].set(taps[_TAPS])
    a_hi, a_lo = _split_bf16(a_full)

    thr1 = jnp.reshape(jnp.float32(THRESH) - bn_shift.reshape(()).astype(jnp.float32),
                       (1,))

    w1_pad = jnp.pad(w1.astype(jnp.float32),
                     ((0, P_PAD - P), (0, N_PAD - F_OUT)))     # zero K rows 169..255
    w1_hi, w1_lo = _split_bf16(w1_pad)
    b1_pad = jnp.pad(b1.reshape(1, F_OUT).astype(jnp.float32),
                     ((0, 0), (0, N_PAD - F_OUT)))

    grid = (b_pad // bt,)
    flops = grid[0] * (3 * 2 * bt * HW * P_PAD + 2 * 2 * bt * P_PAD * N_PAD)
    bytes_accessed = (b_pad * HW * 4            # image read
                      + 2 * HW * P_PAD * 2      # A hi/lo
                      + 2 * P_PAD * N_PAD * 2   # w1 hi/lo
                      + N_PAD * 4               # bias
                      + b_pad * N_PAD * 2)      # bf16 spike output

    out = pl.pallas_call(
        net_fwd_kernel,
        out_shape=jax.ShapeDtypeStruct((b_pad, N_PAD), jnp.bfloat16),
        grid=grid,
        in_specs=[
            pl.BlockSpec(memory_space=pltpu.MemorySpace.SMEM),   # thr (1,)
            pl.BlockSpec((bt, HW), lambda i: (i, 0)),            # image tile
            pl.BlockSpec((HW, P_PAD), lambda i: (0, 0)),         # A hi (resident)
            pl.BlockSpec((HW, P_PAD), lambda i: (0, 0)),         # A lo (resident)
            pl.BlockSpec((P_PAD, N_PAD), lambda i: (0, 0)),      # w1 hi (resident)
            pl.BlockSpec((P_PAD, N_PAD), lambda i: (0, 0)),      # w1 lo (resident)
            pl.BlockSpec((1, N_PAD), lambda i: (0, 0)),          # b1 (resident)
        ],
        out_specs=pl.BlockSpec((bt, N_PAD), lambda i: (i, 0)),
        compiler_params=pltpu.CompilerParams(
            dimension_semantics=("parallel",)),
        cost_estimate=pl.CostEstimate(flops=int(flops), transcendentals=0,
                                      bytes_accessed=int(bytes_accessed)),
    )(thr1, x2d, a_hi, a_lo, w1_hi, w1_lo, b1_pad)

    return out[:B, :F_OUT].astype(jnp.float32)


def net_forward_ref(x_nchw, conv_w, bn_scale, bn_shift, w1, b1):
    # pure-JAX reference mirroring the PyTorch forward (BN in eval mode).
    # HIGHEST precision = faithful f32 conv/linear (matches torch f32 semantics).
    conv = lax.conv_general_dilated(x_nchw, conv_w, (STRIDE, STRIDE), 'VALID',
                                    dimension_numbers=('NCHW', 'OIHW', 'NCHW'),
                                    precision=lax.Precision.HIGHEST)
    y = conv * bn_scale[0, 0] + bn_shift[0, 0]
    s1 = (y / TAU >= V_TH).astype(jnp.float32).reshape(x_nchw.shape[0], -1)
    z = jnp.dot(s1, w1, precision=lax.Precision.HIGHEST) + b1
    return (z / TAU >= V_TH).astype(jnp.float32)


if __name__ == "__main__":
    key = jax.random.PRNGKey(0)
    k_x, k_cw, k_w1, k_b1 = jax.random.split(key, 4)

    B = 2
    x = jax.random.normal(k_x, (B, IN_CH, H, W), dtype=jnp.float32) * 3.0

    # deterministic parameter init (shapes as in Net.__init__)
    conv_w = jax.random.normal(k_cw, (OUT_CH, IN_CH, KS, KS), dtype=jnp.float32) * 0.5
    # BatchNorm2d eval-mode defaults: gamma=1, beta=0, running_mean=0, running_var=1
    eps = 1e-5
    gamma, beta, run_mean, run_var = 1.0, 0.0, 0.0, 1.0
    scale = gamma / np.sqrt(run_var + eps)
    shift = beta - run_mean * scale
    bn_scale = jnp.full((1, 1), scale, dtype=jnp.float32)
    bn_shift = jnp.full((1, 1), shift, dtype=jnp.float32)
    w1 = jax.random.normal(k_w1, (P, F_OUT), dtype=jnp.float32) * (1.0 / np.sqrt(P))
    b1 = jax.random.normal(k_b1, (1, F_OUT), dtype=jnp.float32) * 0.1

    fwd = jax.jit(net_forward)
    out = jax.block_until_ready(fwd(x, conv_w, bn_scale, bn_shift, w1, b1))

    ref = net_forward_ref(x, conv_w, bn_scale, bn_shift, w1, b1)
    assert out.shape == (B, F_OUT)
    assert np.allclose(np.asarray(out), np.asarray(ref), atol=1e-5), "mismatch vs reference"

    # TODO(synk): multi-timestep / stateful LIF membrane dynamics (carry-over of
    # v between calls) are not modeled; this is the single-step-from-rest forward.
    print("KERNEL_OK")
</pallas_src>

<mosaic_0001>
module attributes {stable_mosaic.version = 11 : i64} {
  func.func @net_fwd_kernel(%arg0: i32, %arg1: memref<1xf32, #tpu.memory_space<smem>>, %arg2: memref<8x784xf32, #tpu.memory_space<vmem>>, %arg3: memref<784x256xbf16, #tpu.memory_space<vmem>>, %arg4: memref<784x256xbf16, #tpu.memory_space<vmem>>, %arg5: memref<256x128xbf16, #tpu.memory_space<vmem>>, %arg6: memref<256x128xbf16, #tpu.memory_space<vmem>>, %arg7: memref<1x128xf32, #tpu.memory_space<vmem>>, %arg8: memref<8x128xbf16, #tpu.memory_space<vmem>>) attributes {dimension_semantics = [#tpu.dimension_semantics<parallel>], iteration_bounds = array<i64: 1>, scalar_prefetch = 0 : i64, scratch_operands = 0 : i64, tpu.core_type = #tpu.core_type<tc>, window_params = [{transform_indices = @transform_0, window_bounds = array<i64: 1>}, {transform_indices = @transform_1, window_bounds = array<i64: 8, 784>}, {pipeline_mode = #tpu.pipeline_mode<synchronous>, transform_indices = @transform_2, window_bounds = array<i64: 784, 256>}, {pipeline_mode = #tpu.pipeline_mode<synchronous>, transform_indices = @transform_3, window_bounds = array<i64: 784, 256>}, {pipeline_mode = #tpu.pipeline_mode<synchronous>, transform_indices = @transform_4, window_bounds = array<i64: 256, 128>}, {pipeline_mode = #tpu.pipeline_mode<synchronous>, transform_indices = @transform_5, window_bounds = array<i64: 256, 128>}, {pipeline_mode = #tpu.pipeline_mode<synchronous>, transform_indices = @transform_6, window_bounds = array<i64: 1, 128>}, {transform_indices = @transform_7, window_bounds = array<i64: 8, 128>}]} {
    %c0 = arith.constant 0 : index
    %c0_0 = arith.constant 0 : index
    %0 = vector.load %arg2[%c0, %c0_0] : memref<8x784xf32, #tpu.memory_space<vmem>>, vector<8x784xf32>
    %1 = arith.truncf %0 : vector<8x784xf32> to vector<8x784xbf16>
    %2 = arith.extf %1 : vector<8x784xbf16> to vector<8x784xf32>
    %3 = arith.subf %0, %2 : vector<8x784xf32>
    %4 = arith.truncf %3 : vector<8x784xf32> to vector<8x784xbf16>
    %c0_1 = arith.constant 0 : index
    %c0_2 = arith.constant 0 : index
    %5 = vector.load %arg3[%c0_1, %c0_2] : memref<784x256xbf16, #tpu.memory_space<vmem>>, vector<784x256xbf16>
    %cst = arith.constant dense<0.000000e+00> : vector<8x256xf32>
    %6 = tpu.matmul %1, %5, %cst {dimension_numbers = #tpu.dot_dimension_numbers<[1], [0], [0], [1], [0, 0, 1, 1], [], []>} : vector<8x784xbf16>, vector<784x256xbf16>, vector<8x256xf32> -> vector<8x256xf32>
    %c0_3 = arith.constant 0 : index
    %c0_4 = arith.constant 0 : index
    %7 = vector.load %arg3[%c0_3, %c0_4] : memref<784x256xbf16, #tpu.memory_space<vmem>>, vector<784x256xbf16>
    %cst_5 = arith.constant dense<0.000000e+00> : vector<8x256xf32>
    %8 = tpu.matmul %4, %7, %cst_5 {dimension_numbers = #tpu.dot_dimension_numbers<[1], [0], [0], [1], [0, 0, 1, 1], [], []>} : vector<8x784xbf16>, vector<784x256xbf16>, vector<8x256xf32> -> vector<8x256xf32>
    %9 = arith.addf %6, %8 : vector<8x256xf32>
    %c0_6 = arith.constant 0 : index
    %c0_7 = arith.constant 0 : index
    %10 = vector.load %arg4[%c0_6, %c0_7] : memref<784x256xbf16, #tpu.memory_space<vmem>>, vector<784x256xbf16>
    %cst_8 = arith.constant dense<0.000000e+00> : vector<8x256xf32>
    %11 = tpu.matmul %1, %10, %cst_8 {dimension_numbers = #tpu.dot_dimension_numbers<[1], [0], [0], [1], [0, 0, 1, 1], [], []>} : vector<8x784xbf16>, vector<784x256xbf16>, vector<8x256xf32> -> vector<8x256xf32>
    %12 = arith.addf %9, %11 : vector<8x256xf32>
    %c0_9 = arith.constant 0 : index
    %13 = memref.load %arg1[%c0_9] : memref<1xf32, #tpu.memory_space<smem>>
    %14 = vector.broadcast %13 : f32 to vector<8x256xf32>
    %15 = arith.cmpf oge, %12, %14 : vector<8x256xf32>
    %cst_10 = arith.constant 1.000000e+00 : f32
    %cst_11 = arith.constant 0.000000e+00 : f32
    %16 = vector.broadcast %cst_10 : f32 to vector<8x256xf32>
    %17 = vector.broadcast %cst_11 : f32 to vector<8x256xf32>
    %18 = arith.select %15, %16, %17 : vector<8x256xi1>, vector<8x256xf32>
    %19 = arith.truncf %18 : vector<8x256xf32> to vector<8x256xbf16>
    %c0_12 = arith.constant 0 : index
    %c0_13 = arith.constant 0 : index
    %20 = vector.load %arg5[%c0_12, %c0_13] : memref<256x128xbf16, #tpu.memory_space<vmem>>, vector<256x128xbf16>
    %cst_14 = arith.constant dense<0.000000e+00> : vector<8x128xf32>
    %21 = tpu.matmul %19, %20, %cst_14 {dimension_numbers = #tpu.dot_dimension_numbers<[1], [0], [0], [1], [0, 0, 1, 1], [], []>} : vector<8x256xbf16>, vector<256x128xbf16>, vector<8x128xf32> -> vector<8x128xf32>
    %c0_15 = arith.constant 0 : index
    %c0_16 = arith.constant 0 : index
    %22 = vector.load %arg6[%c0_15, %c0_16] : memref<256x128xbf16, #tpu.memory_space<vmem>>, vector<256x128xbf16>
    %cst_17 = arith.constant dense<0.000000e+00> : vector<8x128xf32>
    %23 = tpu.matmul %19, %22, %cst_17 {dimension_numbers = #tpu.dot_dimension_numbers<[1], [0], [0], [1], [0, 0, 1, 1], [], []>} : vector<8x256xbf16>, vector<256x128xbf16>, vector<8x128xf32> -> vector<8x128xf32>
    %24 = arith.addf %21, %23 : vector<8x128xf32>
    %c0_18 = arith.constant 0 : index
    %c0_19 = arith.constant 0 : index
    %25 = vector.load %arg7[%c0_18, %c0_19] : memref<1x128xf32, #tpu.memory_space<vmem>>, vector<1x128xf32>
    %26 = vector.broadcast %25 : vector<1x128xf32> to vector<8x128xf32>
    %27 = arith.addf %24, %26 : vector<8x128xf32>
    %cst_20 = arith.constant 2.000000e+00 : f32
    %28 = vector.broadcast %cst_20 : f32 to vector<8x128xf32>
    %29 = arith.cmpf oge, %27, %28 : vector<8x128xf32>
    %cst_21 = arith.constant 1.000000e+00 : f32
    %cst_22 = arith.constant 0.000000e+00 : f32
    %30 = vector.broadcast %cst_21 : f32 to vector<8x128xf32>
    %31 = vector.broadcast %cst_22 : f32 to vector<8x128xf32>
    %32 = arith.select %29, %30, %31 : vector<8x128xi1>, vector<8x128xf32>
    %33 = arith.truncf %32 : vector<8x128xf32> to vector<8x128xbf16>
    %c0_23 = arith.constant 0 : index
    %c0_24 = arith.constant 0 : index
    %34 = vector.load %arg8[%c0_23, %c0_24] : memref<8x128xbf16, #tpu.memory_space<vmem>>, vector<8x128xbf16>
    tpu.vector_store %arg8[%c0_23, %c0_24], %33 {strides = array<i32>} : memref<8x128xbf16, #tpu.memory_space<vmem>>, vector<8x128xbf16>,
    return
  }
  func.func @transform_0(%arg0: i32) -> i32 {
    %c0_i32 = arith.constant 0 : i32
    %c0_i32_0 = arith.constant 0 : i32
    return %c0_i32 : i32
  }
  func.func @transform_1(%arg0: i32) -> (i32, i32) {
    %c0_i32 = arith.constant 0 : i32
    %c0_i32_0 = arith.constant 0 : i32
    return %arg0, %c0_i32 : i32, i32
  }
  func.func @transform_2(%arg0: i32) -> (i32, i32) {
    %c0_i32 = arith.constant 0 : i32
    %c0_i32_0 = arith.constant 0 : i32
    %c0_i32_1 = arith.constant 0 : i32
    return %c0_i32, %c0_i32_0 : i32, i32
  }
  func.func @transform_3(%arg0: i32) -> (i32, i32) {
    %c0_i32 = arith.constant 0 : i32
    %c0_i32_0 = arith.constant 0 : i32
    %c0_i32_1 = arith.constant 0 : i32
    return %c0_i32, %c0_i32_0 : i32, i32
  }
  func.func @transform_4(%arg0: i32) -> (i32, i32) {
    %c0_i32 = arith.constant 0 : i32
    %c0_i32_0 = arith.constant 0 : i32
    %c0_i32_1 = arith.constant 0 : i32
    return %c0_i32, %c0_i32_0 : i32, i32
  }
  func.func @transform_5(%arg0: i32) -> (i32, i32) {
    %c0_i32 = arith.constant 0 : i32
    %c0_i32_0 = arith.constant 0 : i32
    %c0_i32_1 = arith.constant 0 : i32
    return %c0_i32, %c0_i32_0 : i32, i32
  }
  func.func @transform_6(%arg0: i32) -> (i32, i32) {
    %c0_i32 = arith.constant 0 : i32
    %c0_i32_0 = arith.constant 0 : i32
    %c0_i32_1 = arith.constant 0 : i32
    return %c0_i32, %c0_i32_0 : i32, i32
  }
  func.func @transform_7(%arg0: i32) -> (i32, i32) {
    %c0_i32 = arith.constant 0 : i32
    %c0_i32_0 = arith.constant 0 : i32
    return %arg0, %c0_i32 : i32, i32
  }
}

</mosaic_0001>

<bundles_post_ra>
// kernel: net_forward.1
= control target key start
LH: loop header
LB: loop body
LE: loop exit
PB: predicated region body
PF: predicated region fallthrough
CT: control target
= control target key end

     0   :  { %vm648_vm0 = vcmask 130048   ;;  %s5153_s2 = inlined_call_operand.vmem [shape: bf16[784,256], index: 2, kind: input, shape index: {}]   ;;  %s5154_s1 = inlined_call_operand.vmem [shape: f32[8,784], index: 1, kind: input, shape index: {}]   ;;  %s5155_s3 = inlined_call_operand.vmem [shape: bf16[784,256], index: 3, kind: input, shape index: {}]   ;;  %s5156_s5 = inlined_call_operand.vmem [shape: bf16[256,128], index: 5, kind: input, shape index: {}]   ;;  %s5157_s4 = inlined_call_operand.vmem [shape: bf16[256,128], index: 4, kind: input, shape index: {}]   ;;  %s5158_s0 = inlined_call_operand.<no memory space> [shape: f32[1], index: 0, kind: input, shape index: {}]   ;;  %s5159_s6 = inlined_call_operand.vmem [shape: f32[1,128], index: 6, kind: input, shape index: {}]   ;;  %s5160_s7 = inlined_call_operand.vmem [shape: bf16[8,128], index: 7, kind: output, shape index: {}]  }
   0x1   :  { %v2202_v0 = vld [vmem:[%s5153_s2 + $0x70] sm:$0xf]  ;;  %v3085_v1 = vld [vmem:[%s5153_s2 + $0x74] sm:$0xf0]  ;;  %v2194_v11 = vld [vmem:[%s5153_s2 + $0x60] sm:$0xf] }
   0x2   :  { %v2266_v2 = vld [vmem:[%s5153_s2 + $0xf0] sm:$0xf]  ;;  %v3352_v3 = vor.u32 %v3085_v1, %v2202_v0  ;;  %v3101_v4 = vld [vmem:[%s5153_s2 + $0xf4] sm:$0xf0]  ;;  %v3083_v13 = vld [vmem:[%s5153_s2 + $0x64] sm:$0xf0] }
   0x3   :  { %v2330_v5 = vld [vmem:[%s5153_s2 + $0x170] sm:$0xf]  ;;  %v3117_v6 = vld [vmem:[%s5153_s2 + $0x174] sm:$0xf0]  ;;  %v3363_v7 = vor.u32 %v3101_v4, %v2266_v2  ;;  %v2258_v14 = vld [vmem:[%s5153_s2 + $0xe0] sm:$0xf]  ;;  %v3390_v16 = vor.u32 %v3083_v13, %v2194_v11 }
   0x4   :  { %v3365_v8 = vor.u32 %v3117_v6, %v2330_v5  ;;  %v2394_v9 = vld [vmem:[%s5153_s2 + $0x1f0] sm:$0xf]  ;;  %v3133_v10 = vld [vmem:[%s5153_s2 + $0x1f4] sm:$0xf0]  ;;  %652 = vmatpush.bf16.msra.mxu0 %v3352_v3  ;;  %v3099_v15 = vld [vmem:[%s5153_s2 + $0xe4] sm:$0xf0] }
   0x5   :  { %v3377_v12 = vor.u32 %v3133_v10, %v2394_v9  ;;  %665 = vmatpush.bf16.msra.mxu1 %v3363_v7  ;;  %v3392_v17 = vor.u32 %v3099_v15, %v2258_v14  ;;  %v2322_v18 = vld [vmem:[%s5153_s2 + $0x160] sm:$0xf]  ;;  %v3115_v19 = vld [vmem:[%s5153_s2 + $0x164] sm:$0xf0]  ;;  %v2186_v23 = vld [vmem:[%s5153_s2 + $0x50] sm:$0xf] }
   0x6   :  { %678 = vmatpush.bf16.msra.mxu2 %v3365_v8  ;;  %v2386_v20 = vld [vmem:[%s5153_s2 + $0x1e0] sm:$0xf]  ;;  %v3404_v21 = vor.u32 %v3115_v19, %v2322_v18  ;;  %v3131_v22 = vld [vmem:[%s5153_s2 + $0x1e4] sm:$0xf0]  ;;  %v3081_v24 = vld [vmem:[%s5153_s2 + $0x54] sm:$0xf0] }
   0x7   :  { %691 = vmatpush.bf16.msra.mxu3 %v3377_v12  ;;  %v3415_v25 = vor.u32 %v3131_v22, %v2386_v20  ;;  %v2250_v26 = vld [vmem:[%s5153_s2 + $0xd0] sm:$0xf]  ;;  %v3097_v27 = vld [vmem:[%s5153_s2 + $0xd4] sm:$0xf0]  ;;  %v3427_v29 = vor.u32 %v3081_v24, %v2186_v23  ;;  %v2178_v35 = vld [vmem:[%s5153_s2 + $0x40] sm:$0xf] }
   0x8   :  { %v2314_v28 = vld [vmem:[%s5153_s2 + $0x150] sm:$0xf]  ;;  %653 = vmatpush.bf16.msra.mxu0 %v3390_v16  ;;  %v3113_v30 = vld [vmem:[%s5153_s2 + $0x154] sm:$0xf0]  ;;  %v3440_v33 = vor.u32 %v3097_v27, %v2250_v26  ;;  %v3079_v36 = vld [vmem:[%s5153_s2 + $0x44] sm:$0xf0] }
   0x9   :  { %v2378_v31 = vld [vmem:[%s5153_s2 + $0x1d0] sm:$0xf]  ;;  %v3129_v32 = vld [vmem:[%s5153_s2 + $0x1d4] sm:$0xf0]  ;;  %666 = vmatpush.bf16.msra.mxu1 %v3392_v17  ;;  %v3442_v34 = vor.u32 %v3113_v30, %v2314_v28  ;;  %v2242_v37 = vld [vmem:[%s5153_s2 + $0xc0] sm:$0xf]  ;;  %v3472_v44 = vor.u32 %v3079_v36, %v2178_v35 }
   0xa   :  { %679 = vmatpush.bf16.msra.mxu2 %v3404_v21  ;;  %v3454_v38 = vor.u32 %v3129_v32, %v2378_v31  ;;  %v3095_v39 = vld [vmem:[%s5153_s2 + $0xc4] sm:$0xf0]  ;;  %v2306_v40 = vld [vmem:[%s5153_s2 + $0x140] sm:$0xf]  ;;  %v2170_v47 = vld [vmem:[%s5153_s2 + $0x30] sm:$0xf] }
   0xb   :  { %692 = vmatpush.bf16.msra.mxu3 %v3415_v25  ;;  %v3111_v41 = vld [vmem:[%s5153_s2 + $0x144] sm:$0xf0]  ;;  %v2370_v42 = vld [vmem:[%s5153_s2 + $0x1c0] sm:$0xf]  ;;  %v3476_v45 = vor.u32 %v3095_v39, %v2242_v37  ;;  %v3077_v48 = vld [vmem:[%s5153_s2 + $0x34] sm:$0xf0] }
   0xc   :  { %v3127_v43 = vld [vmem:[%s5153_s2 + $0x1c4] sm:$0xf0]  ;;  %654 = vmatpush.bf16.msra.mxu0 %v3427_v29  ;;  %v3478_v46 = vor.u32 %v3111_v41, %v2306_v40  ;;  %v2234_v49 = vld [vmem:[%s5153_s2 + $0xb0] sm:$0xf]  ;;  %v3093_v51 = vld [vmem:[%s5153_s2 + $0xb4] sm:$0xf0]  ;;  %v3508_v56 = vor.u32 %v3077_v48, %v2170_v47 }
   0xd   :  { %667 = vmatpush.bf16.msra.mxu1 %v3440_v33  ;;  %v3490_v50 = vor.u32 %v3127_v43, %v2370_v42  ;;  %v2298_v52 = vld [vmem:[%s5153_s2 + $0x130] sm:$0xf]  ;;  %v3109_v53 = vld [vmem:[%s5153_s2 + $0x134] sm:$0xf0]  ;;  %v3512_v57 = vor.u32 %v3093_v51, %v2234_v49  ;;  %v2162_v59 = vld [vmem:[%s5153_s2 + $0x20] sm:$0xf] }
   0xe   :  { %680 = vmatpush.bf16.msra.mxu2 %v3442_v34  ;;  %v2362_v54 = vld [vmem:[%s5153_s2 + $0x1b0] sm:$0xf]  ;;  %v3125_v55 = vld [vmem:[%s5153_s2 + $0x1b4] sm:$0xf0]  ;;  %v3514_v58 = vor.u32 %v3109_v53, %v2298_v52  ;;  %v3075_v60 = vld [vmem:[%s5153_s2 + $0x24] sm:$0xf0] }
   0xf   :  { %693 = vmatpush.bf16.msra.mxu3 %v3454_v38  ;;  %v2226_v61 = vld [vmem:[%s5153_s2 + $0xa0] sm:$0xf]  ;;  %v3526_v62 = vor.u32 %v3125_v55, %v2362_v54  ;;  %v3091_v63 = vld [vmem:[%s5153_s2 + $0xa4] sm:$0xf0]  ;;  %v3544_v5 = vor.u32 %v3075_v60, %v2162_v59  ;;  %v2154_v10 = vld [vmem:[%s5153_s2 + $0x10] sm:$0xf] }
  0x10   :  { %655 = vmatpush.bf16.msra.mxu0 %v3472_v44  ;;  %v2290_v0 = vld [vmem:[%s5153_s2 + $0x120] sm:$0xf]  ;;  %v3107_v1 = vld [vmem:[%s5153_s2 + $0x124] sm:$0xf0]  ;;  %v3548_v6 = vor.u32 %v3091_v63, %v2226_v61  ;;  %v3073_v11 = vld [vmem:[%s5153_s2 + $0x14] sm:$0xf0] }
  0x11   :  { %668 = vmatpush.bf16.msra.mxu1 %v3476_v45  ;;  %v2354_v2 = vld [vmem:[%s5153_s2 + $0x1a0] sm:$0xf]  ;;  %v3123_v4 = vld [vmem:[%s5153_s2 + $0x1a4] sm:$0xf0]  ;;  %v3550_v9 = vor.u32 %v3107_v1, %v2290_v0  ;;  %v2218_v13 = vld [vmem:[%s5153_s2 + $0x90] sm:$0xf]  ;;  %v3583_v24 = vor.u32 %v3073_v11, %v2154_v10 }
  0x12   :  { %681 = vmatpush.bf16.msra.mxu2 %v3478_v46  ;;  %v3562_v14 = vor.u32 %v3123_v4, %v2354_v2  ;;  %v3089_v15 = vld [vmem:[%s5153_s2 + $0x94] sm:$0xf0]  ;;  %v2282_v18 = vld [vmem:[%s5153_s2 + $0x110] sm:$0xf]  ;;  %v2146_v23 = vld [vmem:[%s5153_s2] sm:$0xf] }
  0x13   :  { %694 = vmatpush.bf16.msra.mxu3 %v3490_v50  ;;  %v3105_v19 = vld [vmem:[%s5153_s2 + $0x114] sm:$0xf0]  ;;  %v2346_v20 = vld [vmem:[%s5153_s2 + $0x190] sm:$0xf]  ;;  %v3071_v26 = vld [vmem:[%s5153_s2 + $0x4] sm:$0xf0]  ;;  %v3596_v30 = vor.u32 %v3089_v15, %v2218_v13 }
  0x14   :  { %656 = vmatpush.bf16.msra.mxu0 %v3508_v56  ;;  %v3121_v22 = vld [vmem:[%s5153_s2 + $0x194] sm:$0xf0]  ;;  %v2210_v27 = vld [vmem:[%s5153_s2 + $0x80] sm:$0xf]  ;;  %v3087_v28 = vld [vmem:[%s5153_s2 + $0x84] sm:$0xf0]  ;;  %v3598_v31 = vor.u32 %v3105_v19, %v2282_v18  ;;  %v3633_v49 = vor.u32 %v3071_v26, %v2146_v23 }
  0x15   :  { %669 = vmatpush.bf16.msra.mxu1 %v3512_v57  ;;  %v2274_v32 = vld [vmem:[%s5153_s2 + $0x100] sm:$0xf]  ;;  %v30_v35 = vld [vmem:[%s5154_s1 + $0x10] sm:$0xff]  ;;  %v31_v36 = vld [vmem:[%s5154_s1 + $0x18] sm:$0xff]  ;;  %v3610_v37 = vor.u32 %v3121_v22, %v2346_v20  ;;  %v3648_v59 = vor.u32 %v3087_v28, %v2210_v27 }
  0x16   :  { %682 = vmatpush.bf16.msra.mxu2 %v3514_v58  ;;  %v3103_v39 = vld [vmem:[%s5153_s2 + $0x104] sm:$0xf0]  ;;  %v2338_v40 = vld [vmem:[%s5153_s2 + $0x180] sm:$0xf]  ;;  %v3621_v42 = vpack.c.bf16 %v31_v36, %v30_v35  ;;  %v2458_v43 = vld [vmem:[%s5153_s2 + $0x270] sm:$0xf] }
  0x17   :  { %695 = vmatpush.bf16.msra.mxu3 %v3526_v62  ;;  %v3119_v41 = vld [vmem:[%s5153_s2 + $0x184] sm:$0xf0]  ;;  %v3149_v47 = vld [vmem:[%s5153_s2 + $0x274] sm:$0xf0]  ;;  %v2522_v48 = vld [vmem:[%s5153_s2 + $0x2f0] sm:$0xf]  ;;  %v3650_v60 = vor.u32 %v3103_v39, %v2274_v32 }
  0x18   :  { %657 = vmatpush.bf16.msra.mxu0 %v3544_v5  ;;  %v3165_v51 = vld [vmem:[%s5153_s2 + $0x2f4] sm:$0xf0]  ;;  %v3084_v52 = vld [vmem:[%s5153_s2 + $0x74] sm:$0xf]  ;;  %v2204_v53 = vld [vmem:[%s5153_s2 + $0x78] sm:$0xf0]  ;;  %v41_v54 = vunpack.c.l.bf16 %v3621_v42  ;;  %v42_v55 = vunpack.c.h.bf16 %v3621_v42  ;;  %v3659_v0 = vor.u32 %v3119_v41, %v2338_v40  ;;  %v3661_v1 = vor.u32 %v3149_v47, %v2458_v43 }
  0x19   :  { %670 = vmatpush.bf16.msra.mxu1 %v3548_v6  ;;  %5214 = vst [vmem:[#allocation3_spill] sm:$0xff] %v3650_v60  ;;  %v2530_v61 = vld [vmem:[%s5153_s2 + $0x300] sm:$0xf]  ;;  %v3167_v63 = vld [vmem:[%s5153_s2 + $0x304] sm:$0xf0]  ;;  %v3669_v13 = vor.u32 %v3165_v51, %v2522_v48  ;;  %v3671_v15 = vor.u32 %v3084_v52, %v2204_v53 }
  0x1a   :  { %683 = vmatpush.bf16.msra.mxu2 %v3550_v9  ;;  %5215 = vst [vmem:[#allocation4_spill] sm:$0xff] %v3659_v0  ;;  %v48_v2 = vsub.f32 %v30_v35, %v41_v54  ;;  %v3100_v4 = vld [vmem:[%s5153_s2 + $0xf4] sm:$0xf]  ;;  %v2268_v10 = vld [vmem:[%s5153_s2 + $0xf8] sm:$0xf0]  ;;  %v49_v11 = vsub.f32 %v31_v36, %v42_v55  ;;  %v3683_v22 = vor.u32 %v3167_v63, %v2530_v61  ;;  %v28_v36 = vld [vmem:[%s5154_s1] sm:$0xff] }
  0x1b   :  { %696 = vmatpush.bf16.msra.mxu3 %v3562_v14  ;;  %5216 = vst [vmem:[#allocation5_spill] sm:$0xff] %v3669_v13  ;;  %v2450_v18 = vld [vmem:[%s5153_s2 + $0x260] sm:$0xf]  ;;  %v3147_v19 = vld [vmem:[%s5153_s2 + $0x264] sm:$0xf0]  ;;  %v3708_v39 = vor.u32 %v3100_v4, %v2268_v10 }
  0x1c   :  { %658 = vmatpush.bf16.msra.mxu0 %v3583_v24  ;;  %5217 = vst [vmem:[#allocation6_spill] sm:$0xff] %v3671_v15  ;;  %v2514_v20 = vld [vmem:[%s5153_s2 + $0x2e0] sm:$0xf]  ;;  %v3163_v23 = vld [vmem:[%s5153_s2 + $0x2e4] sm:$0xf0]  ;;  %v3696_v28 = vpack.c.bf16 %v48_v2, %v48_v2  ;;  %v3701_v35 = vpack.c.bf16 %v49_v11, %v49_v11  ;;  %v3710_v40 = vor.u32 %v3147_v19, %v2450_v18 }
  0x1d   :  { %671 = vmatpush.bf16.msra.mxu1 %v3596_v30  ;;  %5218 = vst [vmem:[#allocation7_spill] sm:$0xff] %v3683_v22  ;;  %v3082_v26 = vld [vmem:[%s5153_s2 + $0x64] sm:$0xf]  ;;  %v2196_v27 = vld [vmem:[%s5153_s2 + $0x68] sm:$0xf0]  ;;  %v3723_v48 = vor.u32 %v3163_v23, %v2514_v20 }
  0x1e   :  { %684 = vmatpush.bf16.msra.mxu2 %v3598_v31  ;;  %v3098_v32 = vld [vmem:[%s5153_s2 + $0xe4] sm:$0xf]  ;;  %5219 = vst [vmem:[#allocation8_spill] sm:$0xff] %v3708_v39  ;;  %v2260_v41 = vld [vmem:[%s5153_s2 + $0xe8] sm:$0xf0]  ;;  %v3725_v51 = vor.u32 %v3082_v26, %v2196_v27 }
  0x1f   :  { %697 = vmatpush.bf16.msra.mxu3 %v3610_v37  ;;  %5220 = vst [vmem:[#allocation9_spill] sm:$0xff] %v3710_v40  ;;  %v2442_v43 = vld [vmem:[%s5153_s2 + $0x250] sm:$0xf]  ;;  %v29_v47 = vld [vmem:[%s5154_s1 + $0x8] sm:$0xff]  ;;  %v3145_v52 = vld [vmem:[%s5153_s2 + $0x254] sm:$0xf0]  ;;  %v3751_v10 = vor.u32 %v3098_v32, %v2260_v41 }
  0x20   :  { %659 = vmatpush.bf16.msra.mxu0 %v3633_v49  ;;  %5221 = vst [vmem:[#allocation10_spill] sm:$0xff] %v3723_v48  ;;  %v2506_v53 = vld [vmem:[%s5153_s2 + $0x2d0] sm:$0xf]  ;;  %v3161_v54 = vld [vmem:[%s5153_s2 + $0x2d4] sm:$0xf0]  ;;  %v3736_v55 = vpack.c.bf16 %v29_v47, %v28_v36  ;;  %v3753_v11 = vor.u32 %v3145_v52, %v2442_v43 }
  0x21   :  { %672 = vmatpush.bf16.msra.mxu1 %v3648_v59  ;;  %5222 = vst [vmem:[#allocation11_spill] sm:$0xff] %v3725_v51  ;;  %v3080_v61 = vld [vmem:[%s5153_s2 + $0x54] sm:$0xf]  ;;  %v2188_v63 = vld [vmem:[%s5153_s2 + $0x58] sm:$0xf0]  ;;  %v3755_v18 = vor.u32 %v3161_v54, %v2506_v53 }
  0x22   :  { %685 = vmatpush.bf16.msra.mxu2 %v3650_v60  ;;  %v39_v2 = vunpack.c.l.bf16 %v3736_v55  ;;  %v40_v4 = vunpack.c.h.bf16 %v3736_v55  ;;  %5223 = vst [vmem:[#allocation12_spill] sm:$0xff] %v3751_v10  ;;  %v3096_v19 = vld [vmem:[%s5153_s2 + $0xd4] sm:$0xf]  ;;  %v2252_v20 = vld [vmem:[%s5153_s2 + $0xd8] sm:$0xf0]  ;;  %v3765_v23 = vor.u32 %v3080_v61, %v2188_v63 }
  0x23   :  { %698 = vmatpush.bf16.msra.mxu3 %v3659_v0  ;;  %5224 = vst [vmem:[#allocation13_spill] sm:$0xff] %v3753_v11  ;;  %v2434_v26 = vld [vmem:[%s5153_s2 + $0x240] sm:$0xf]  ;;  %v3143_v27 = vld [vmem:[%s5153_s2 + $0x244] sm:$0xf0] }
  0x24   :  { %704 = vmatpush.bf16.msrb.mxu0 %v3661_v1  ;;  %5225 = vst [vmem:[#allocation14_spill] sm:$0xff] %v3755_v18  ;;  %v2498_v32 = vld [vmem:[%s5153_s2 + $0x2c0] sm:$0xf]  ;;  %v46_v41 = vsub.f32 %v28_v36, %v39_v2  ;;  %v47_v43 = vsub.f32 %v29_v47, %v40_v4  ;;  %v3159_v52 = vld [vmem:[%s5153_s2 + $0x2c4] sm:$0xf0]  ;;  %v3791_v36 = vor.u32 %v3096_v19, %v2252_v20 }
  0x25   :  { %717 = vmatpush.bf16.msrb.mxu1 %v3669_v13  ;;  %686 = vmatmul.bf16.vlgmr.msra.gmra.mxu2 %v3696_v28  ;;  %5226 = vst [vmem:[#allocation15_spill] sm:$0xff] %v3765_v23  ;;  %v3078_v53 = vld [vmem:[%s5153_s2 + $0x44] sm:$0xf]  ;;  %v2180_v54 = vld [vmem:[%s5153_s2 + $0x48] sm:$0xf0]  ;;  %v3793_v47 = vor.u32 %v3143_v27, %v2434_v26 }
  0x26   :  { %737 = vmatpush.bf16.msrb.mxu2 %v3683_v22  ;;  %699 = vmatmul.bf16.vlgmr.msra.gmra.mxu3 %v3701_v35  ;;  %v3785_v61 = vpack.c.bf16 %v46_v41, %v46_v41  ;;  %v3787_v63 = vpack.c.bf16 %v47_v43, %v47_v43  ;;  %5227 = vst [vmem:[#allocation16_spill] sm:$0xff] %v3791_v36  ;;  %v3094_v2 = vld [vmem:[%s5153_s2 + $0xc4] sm:$0xf]  ;;  %v2244_v4 = vld [vmem:[%s5153_s2 + $0xc8] sm:$0xf0] }
  0x27   :  { %743 = vmatpush.bf16.msrb.mxu3 %v3671_v15  ;;  %5228 = vst [vmem:[#allocation17_spill] sm:$0xff] %v3793_v47  ;;  %v3803_v41 = vor.u32 %v3159_v52, %v2498_v32  ;;  %v3805_v43 = vor.u32 %v3078_v53, %v2180_v54  ;;  %v2426_v19 = vld [vmem:[%s5153_s2 + $0x230] sm:$0xf]  ;;  %v3141_v20 = vld [vmem:[%s5153_s2 + $0x234] sm:$0xf0] }
  0x28   :  { %705 = vmatpush.bf16.msrb.mxu0 %v3710_v40  ;;  %v2490_v26 = vld [vmem:[%s5153_s2 + $0x2b0] sm:$0xf]  ;;  %673 = vmatmul.bf16.vlgmr.msra.gmra.mxu1 %v3787_v63  ;;  %v3157_v27 = vld [vmem:[%s5153_s2 + $0x2b4] sm:$0xf0]  ;;  %v3076_v32 = vld [vmem:[%s5153_s2 + $0x34] sm:$0xf] }
  0x29   :  { %718 = vmatpush.bf16.msrb.mxu1 %v3723_v48  ;;  %5229 = vst [vmem:[#allocation18_spill] sm:$0xff] %v3803_v41  ;;  %660 = vmatmul.bf16.vlgmr.msra.gmra.mxu0 %v3785_v61  ;;  %v2172_v52 = vld [vmem:[%s5153_s2 + $0x38] sm:$0xf0]  ;;  %v3092_v53 = vld [vmem:[%s5153_s2 + $0xb4] sm:$0xf] }
  0x2a   :  { %756 = vmatpush.bf16.msra.mxu2 %v3708_v39  ;;  %5230 = vst [vmem:[#allocation19_spill] sm:$0xff] %v3805_v43  ;;  %v34_v54 = vld [vmem:[%s5154_s1 + $0x30] sm:$0xff]  ;;  %v2418_v39 = vld [vmem:[%s5153_s2 + $0x220] sm:$0xf]  ;;  %v3090_v22 = vld [vmem:[%s5153_s2 + $0xa4] sm:$0xf] }
  0x2b   :  { %744 = vmatpush.bf16.msrb.mxu3 %v3725_v51  ;;  %v3848_v51 = vpack.c.bf16 %v34_v54, %v34_v54  ;;  %v2228_v48 = vld [vmem:[%s5153_s2 + $0xa8] sm:$0xf0]  ;;  %v3148_v15 = vld [vmem:[%s5153_s2 + $0x274] sm:$0xf]  ;;  %v2460_v0 = vld [vmem:[%s5153_s2 + $0x278] sm:$0xf0] }
  0x2c   :  { %706 = vmatpush.bf16.msrb.mxu0 %v3753_v11  ;;  %v3139_v11 = vld [vmem:[%s5153_s2 + $0x224] sm:$0xf0] }
  0x2d   :  { %719 = vmatpush.bf16.msrb.mxu1 %v3755_v18  ;;  %v2236_v18 = vld [vmem:[%s5153_s2 + $0xb8] sm:$0xf0]  ;;  %5233 = vst [vmem:[#allocation22_spill] sm:$0xff] %v3848_v51 }
  0x2e   :  { %757 = vmatpush.bf16.msra.mxu2 %v3751_v10  ;;  %v3835_v10 = vor.u32 %v3094_v2, %v2244_v4  ;;  %v3852_v2 = vor.u32 %v3157_v27, %v2490_v26  ;;  %v3854_v4 = vor.u32 %v3076_v32, %v2172_v52  ;;  %v3074_v26 = vld [vmem:[%s5153_s2 + $0x24] sm:$0xf]  ;;  %v2164_v27 = vld [vmem:[%s5153_s2 + $0x28] sm:$0xf0]  ;;  %v45_v32 = vunpack.c.l.bf16 %v3848_v51 }
  0x2f   :  { %745 = vmatpush.bf16.msrb.mxu3 %v3765_v23  ;;  %v3837_v23 = vor.u32 %v3141_v20, %v2426_v19  ;;  %v2482_v19 = vld [vmem:[%s5153_s2 + $0x2a0] sm:$0xf] }
  0x30   :  { %707 = vmatpush.bf16.msrb.mxu0 %v3793_v47  ;;  %5231 = vst [vmem:[#allocation20_spill] sm:$0xff] %v3835_v10  ;;  %v32_v20 = vld [vmem:[%s5154_s1 + $0x20] sm:$0xff]  ;;  %v3881_v47 = vor.u32 %v3139_v11, %v2418_v39  ;;  %v52_v60 = vsub.f32 %v34_v54, %v45_v32  ;;  %v2410_v39 = vld [vmem:[%s5153_s2 + $0x210] sm:$0xf]  ;;  %v3137_v11 = vld [vmem:[%s5153_s2 + $0x214] sm:$0xf0] }
  0x31   :  { %5232 = vst [vmem:[#allocation21_spill] sm:$0xff] %v3837_v23  ;;  %720 = vmatpush.bf16.msrb.mxu1 %v3803_v41  ;;  %v3879_v41 = vor.u32 %v3092_v53, %v2236_v18  ;;  %v2474_v18 = vld [vmem:[%s5153_s2 + $0x290] sm:$0xf]  ;;  %v3153_v53 = vld [vmem:[%s5153_s2 + $0x294] sm:$0xf0]  ;;  %v3920_v32 = vor.u32 %v3137_v11, %v2410_v39 }
  0x32   :  { %758 = vmatpush.bf16.msra.mxu2 %v3791_v36  ;;  %5234 = vst [vmem:[#allocation23_spill] sm:$0xff] %v3852_v2  ;;  %v33_v36 = vld [vmem:[%s5154_s1 + $0x28] sm:$0xff]  ;;  %v2156_v54 = vld [vmem:[%s5153_s2 + $0x18] sm:$0xf0]  ;;  %v2466_v11 = vld [vmem:[%s5153_s2 + $0x280] sm:$0xf] }
  0x33   :  { %746 = vmatpush.bf16.msrb.mxu3 %v3805_v43  ;;  %5235 = vst [vmem:[#allocation24_spill] sm:$0xff] %v3854_v4  ;;  %v3155_v43 = vld [vmem:[%s5153_s2 + $0x2a4] sm:$0xf0]  ;;  %v3875_v52 = vpack.c.bf16 %v33_v36, %v32_v20 }
  0x34   :  { %708 = vmatpush.bf16.msrb.mxu0 %v3837_v23  ;;  %5237 = vst [vmem:[#allocation26_spill] sm:$0xff] %v3879_v41  ;;  %v3893_v23 = vor.u32 %v3074_v26, %v2164_v27  ;;  %v3918_v27 = vor.u32 %v3090_v22, %v2228_v48  ;;  %v3934_v22 = vor.u32 %v3153_v53, %v2474_v18  ;;  %v3135_v39 = vld [vmem:[%s5153_s2 + $0x204] sm:$0xf0]  ;;  %v2148_v18 = vld [vmem:[%s5153_s2 + $0x8] sm:$0xf0] }
  0x35   :  { %5236 = vst [vmem:[#allocation25_spill] sm:$0xff] %v3875_v52  ;;  %721 = vmatpush.bf16.msrb.mxu1 %v3852_v2  ;;  %v43_v26 = vunpack.c.l.bf16 %v3875_v52  ;;  %v2402_v2 = vld [vmem:[%s5153_s2 + $0x200] sm:$0xf]  ;;  %v3116_v53 = vld [vmem:[%s5153_s2 + $0x174] sm:$0xf] }
  0x36   :  { %759 = vmatpush.bf16.msra.mxu2 %v3835_v10  ;;  %5238 = vst [vmem:[#allocation27_spill] sm:$0xff] %v3881_v47  ;;  %v3891_v10 = vor.u32 %v3155_v43, %v2482_v19  ;;  %v3072_v43 = vld [vmem:[%s5153_s2 + $0x14] sm:$0xf]  ;;  %v3913_v19 = vpack.c.bf16 %v52_v60, %v52_v60  ;;  %v2220_v60 = vld [vmem:[%s5153_s2 + $0x98] sm:$0xf0]  ;;  %v3971_v40 = vor.u32 %v3135_v39, %v2402_v2 }
  0x37   :  { %747 = vmatpush.bf16.msrb.mxu3 %v3854_v4  ;;  %5240 = vst [vmem:[#allocation29_spill] sm:$0xff] %v3893_v23  ;;  %v3088_v4 = vld [vmem:[%s5153_s2 + $0x94] sm:$0xf]  ;;  %v3936_v48 = vor.u32 %v3072_v43, %v2156_v54  ;;  %v2332_v43 = vld [vmem:[%s5153_s2 + $0x178] sm:$0xf0] }
  0x38   :  { %5239 = vst [vmem:[#allocation28_spill] sm:$0xff] %v3891_v10  ;;  %709 = vmatpush.bf16.msrb.mxu0 %v3881_v47  ;;  %2536 = vmatmul.msk.bf16.vlgmr.msrb.gmra.mxu2 %vm648_vm0, %v3913_v19  ;;  %v3132_v54 = vld [vmem:[%s5153_s2 + $0x1f4] sm:$0xf]  ;;  %v50_v47 = vsub.f32 %v32_v20, %v43_v26  ;;  %v3969_v51 = vor.u32 %v3088_v4, %v2220_v60  ;;  %v3086_v2 = vld [vmem:[%s5153_s2 + $0x84] sm:$0xf] }
  0x39   :  { %722 = vmatpush.bf16.msrb.mxu1 %v3891_v10  ;;  %v2396_v10 = vld [vmem:[%s5153_s2 + $0x1f8] sm:$0xf0]  ;;  %v2212_v4 = vld [vmem:[%s5153_s2 + $0x88] sm:$0xf0]  ;;  %v3991_v60 = vor.u32 %v3116_v53, %v2332_v43 }
  0x3a   :  { %760 = vmatpush.bf16.msra.mxu2 %v3879_v41  ;;  %v44_v41 = vunpack.c.h.bf16 %v3875_v52  ;;  %v3151_v52 = vld [vmem:[%s5153_s2 + $0x284] sm:$0xf0]  ;;  %5241 = vst [vmem:[#allocation30_spill] sm:$0xff] %v3969_v51  ;;  %v3993_v39 = vor.u32 %v3132_v54, %v2396_v10  ;;  %v2324_v10 = vld [vmem:[%s5153_s2 + $0x168] sm:$0xf0] }
  0x3b   :  { %748 = vmatpush.bf16.msrb.mxu3 %v3893_v23  ;;  %v3070_v23 = vld [vmem:[%s5153_s2 + $0x4] sm:$0xf]  ;;  %v3981_v20 = vor.u32 %v3151_v52, %v2466_v11  ;;  %v4004_v52 = vor.u32 %v3148_v15, %v2460_v0  ;;  %v4006_v11 = vpack.c.bf16 %v50_v47, %v50_v47  ;;  %v2388_v53 = vld [vmem:[%s5153_s2 + $0x1e8] sm:$0xf0]  ;;  %v4019_v0 = vor.u32 %v3086_v2, %v2212_v4 }
  0x3c   :  { %710 = vmatpush.bf16.msrb.mxu0 %v3920_v32  ;;  %v51_v13 = vsub.f32 %v33_v36, %v44_v41  ;;  %v3983_v26 = vor.u32 %v3070_v23, %v2148_v18  ;;  %v3164_v36 = vld [vmem:[%s5153_s2 + $0x2f4] sm:$0xf]  ;;  %v2524_v23 = vld [vmem:[%s5153_s2 + $0x2f8] sm:$0xf0]  ;;  %v3114_v41 = vld [vmem:[%s5153_s2 + $0x164] sm:$0xf] }
  0x3d   :  { %723 = vmatpush.bf16.msrb.mxu1 %v3934_v22  ;;  %5243 = vst [vmem:[#allocation32_spill] sm:$0xff] %v4004_v52  ;;  %v3130_v18 = vld [vmem:[%s5153_s2 + $0x1e4] sm:$0xf]  ;;  %v2452_v43 = vld [vmem:[%s5153_s2 + $0x268] sm:$0xf0]  ;;  %v4031_v54 = vor.u32 %v3164_v36, %v2524_v23 }
  0x3e   :  { %761 = vmatpush.bf16.msra.mxu2 %v3918_v27  ;;  %5242 = vst [vmem:[#allocation31_spill] sm:$0xff] %v3983_v26  ;;  %v4021_v15 = vpack.c.bf16 %v51_v13, %v51_v13  ;;  %v3146_v47 = vld [vmem:[%s5153_s2 + $0x264] sm:$0xf]  ;;  %v4035_v13 = vor.u32 %v3114_v41, %v2324_v10  ;;  %v4037_v2 = vor.u32 %v3130_v18, %v2388_v53  ;;  %v3112_v36 = vld [vmem:[%s5153_s2 + $0x154] sm:$0xf] }
  0x3f   :  { %749 = vmatpush.bf16.msrb.mxu3 %v3936_v48  ;;  %5244 = vst [vmem:[#allocation33_spill] sm:$0xff] %v4019_v0  ;;  %v3162_v4 = vld [vmem:[%s5153_s2 + $0x2e4] sm:$0xf]  ;;  %v4050_v23 = vor.u32 %v3146_v47, %v2452_v43  ;;  %v2316_v41 = vld [vmem:[%s5153_s2 + $0x158] sm:$0xf0] }
  0x40   :  { %711 = vmatpush.bf16.msrb.mxu0 %v3971_v40  ;;  %5245 = vst [vmem:[#allocation34_spill] sm:$0xff] %v4031_v54  ;;  %v3128_v10 = vld [vmem:[%s5153_s2 + $0x1d4] sm:$0xf]  ;;  %v2380_v18 = vld [vmem:[%s5153_s2 + $0x1d8] sm:$0xf0] }
  0x41   :  { %724 = vmatpush.bf16.msrb.mxu1 %v3981_v20  ;;  %5246 = vst [vmem:[#allocation35_spill] sm:$0xff] %v4035_v13  ;;  %v3144_v53 = vld [vmem:[%s5153_s2 + $0x254] sm:$0xf]  ;;  %v2444_v47 = vld [vmem:[%s5153_s2 + $0x258] sm:$0xf0] }
  0x42   :  { %762 = vmatpush.bf16.msra.mxu2 %v3969_v51  ;;  %5247 = vst [vmem:[#allocation36_spill] sm:$0xff] %v4037_v2  ;;  %v2516_v51 = vld [vmem:[%s5153_s2 + $0x2e8] sm:$0xf0] }
  0x43   :  { %750 = vmatpush.bf16.msrb.mxu3 %v3983_v26  ;;  %712 = vmatmul.bf16.vlgmr.msrb.gmra.mxu0 %v4006_v11  ;;  %5248 = vst [vmem:[#allocation37_spill] sm:$0xff] %v4050_v23  ;;  %v4070_v43 = vor.u32 %v3162_v4, %v2516_v51  ;;  %v3160_v26 = vld [vmem:[%s5153_s2 + $0x2d4] sm:$0xf]  ;;  %v3110_v51 = vld [vmem:[%s5153_s2 + $0x144] sm:$0xf] }
  0x44   :  { %769 = vmatpush.bf16.msra.mxu0 %v3991_v60  ;;  %725 = vmatmul.bf16.vlgmr.msrb.gmra.mxu1 %v4021_v15  ;;  %v2308_v4 = vld [vmem:[%s5153_s2 + $0x148] sm:$0xf0] }
  0x45   :  { %782 = vmatpush.bf16.msra.mxu1 %v3993_v39  ;;  %5249 = vst [vmem:[#allocation38_spill] sm:$0xff] %v4070_v43 }
  0x46   :  { %763 = vmatpush.bf16.msra.mxu2 %v4019_v0  ;;  %751 = vmatmul.bf16.vlgmr.msrb.gmra.mxu3 %v3785_v61  ;;  %v4075_v0 = vor.u32 %v3112_v36, %v2316_v41  ;;  %v4089_v61 = vor.u32 %v3144_v53, %v2444_v47  ;;  %v3126_v36 = vld [vmem:[%s5153_s2 + $0x1c4] sm:$0xf]  ;;  %v2372_v41 = vld [vmem:[%s5153_s2 + $0x1c8] sm:$0xf0]  ;;  %v4111_v47 = vor.u32 %v3110_v51, %v2308_v4  ;;  %v2300_v51 = vld [vmem:[%s5153_s2 + $0x138] sm:$0xf0] }
  0x47   :  { %795 = vmatpush.bf16.msra.mxu3 %v4004_v52  ;;  %v4077_v52 = vor.u32 %v3128_v10, %v2380_v18  ;;  %v3142_v10 = vld [vmem:[%s5153_s2 + $0x244] sm:$0xf]  ;;  %v2436_v18 = vld [vmem:[%s5153_s2 + $0x248] sm:$0xf0]  ;;  %v3124_v4 = vld [vmem:[%s5153_s2 + $0x1b4] sm:$0xf] }
  0x48   :  { %770 = vmatpush.bf16.msra.mxu0 %v4035_v13  ;;  %5250 = vst [vmem:[#allocation39_spill] sm:$0xff] %v4075_v0  ;;  %v2500_v13 = vld [vmem:[%s5153_s2 + $0x2c8] sm:$0xf0] }
  0x49   :  { %783 = vmatpush.bf16.msra.mxu1 %v4037_v2  ;;  %5251 = vst [vmem:[#allocation40_spill] sm:$0xff] %v4077_v52  ;;  %v3158_v2 = vld [vmem:[%s5153_s2 + $0x2c4] sm:$0xf]  ;;  %764 = vmatmul.bf16.vlgmr.msra.gmra.mxu2 %v3787_v63  ;;  %v3156_v63 = vld [vmem:[%s5153_s2 + $0x2b4] sm:$0xf] }
  0x4a   :  { %808 = vmatpush.bf16.msrb.mxu2 %v4031_v54  ;;  %v2508_v54 = vld [vmem:[%s5153_s2 + $0x2d8] sm:$0xf0]  ;;  %5252 = vst [vmem:[#allocation41_spill] sm:$0xff] %v4089_v61 }
  0x4b   :  { %796 = vmatpush.bf16.msra.mxu3 %v4050_v23  ;;  %v4107_v53 = vor.u32 %v3160_v26, %v2508_v54  ;;  %5254 = vst [vmem:[#allocation43_spill] sm:$0xff] %v4111_v47  ;;  %v4113_v23 = vor.u32 %v3126_v36, %v2372_v41  ;;  %v3108_v26 = vld [vmem:[%s5153_s2 + $0x134] sm:$0xf]  ;;  %v4125_v54 = vor.u32 %v3142_v10, %v2436_v18  ;;  %v2364_v36 = vld [vmem:[%s5153_s2 + $0x1b8] sm:$0xf0] }
  0x4c   :  { %771 = vmatpush.bf16.msra.mxu0 %v4075_v0  ;;  %v3140_v41 = vld [vmem:[%s5153_s2 + $0x234] sm:$0xf]  ;;  %v2428_v10 = vld [vmem:[%s5153_s2 + $0x238] sm:$0xf0]  ;;  %v4144_v18 = vor.u32 %v3158_v2, %v2500_v13  ;;  %v3106_v13 = vld [vmem:[%s5153_s2 + $0x124] sm:$0xf] }
  0x4d   :  { %5253 = vst [vmem:[#allocation42_spill] sm:$0xff] %v4107_v53  ;;  %784 = vmatpush.bf16.msra.mxu1 %v4077_v52  ;;  %v2492_v52 = vld [vmem:[%s5153_s2 + $0x2b8] sm:$0xf0]  ;;  %v4162_v2 = vor.u32 %v3140_v41, %v2428_v10  ;;  %v2420_v41 = vld [vmem:[%s5153_s2 + $0x228] sm:$0xf0] }
  0x4e   :  { %809 = vmatpush.bf16.msrb.mxu2 %v4070_v43  ;;  %5255 = vst [vmem:[#allocation44_spill] sm:$0xff] %v4113_v23  ;;  %v4148_v43 = vor.u32 %v3108_v26, %v2300_v51  ;;  %v2292_v26 = vld [vmem:[%s5153_s2 + $0x128] sm:$0xf0]  ;;  %v3122_v51 = vld [vmem:[%s5153_s2 + $0x1a4] sm:$0xf]  ;;  %v4180_v10 = vor.u32 %v3156_v63, %v2492_v52 }
  0x4f   :  { %797 = vmatpush.bf16.msra.mxu3 %v4089_v61  ;;  %5256 = vst [vmem:[#allocation45_spill] sm:$0xff] %v4125_v54  ;;  %v4150_v61 = vor.u32 %v3124_v4, %v2364_v36  ;;  %v2356_v4 = vld [vmem:[%s5153_s2 + $0x1a8] sm:$0xf0]  ;;  %v3138_v36 = vld [vmem:[%s5153_s2 + $0x224] sm:$0xf] }
  0x50   :  { %5257 = vst [vmem:[#allocation46_spill] sm:$0xff] %v4144_v18  ;;  %772 = vmatpush.bf16.msra.mxu0 %v4111_v47  ;;  %v2484_v47 = vld [vmem:[%s5153_s2 + $0x2a8] sm:$0xf0]  ;;  %v3104_v52 = vld [vmem:[%s5153_s2 + $0x114] sm:$0xf]  ;;  %v4198_v63 = vor.u32 %v3138_v36, %v2420_v41 }
  0x51   :  { %785 = vmatpush.bf16.msra.mxu1 %v4113_v23  ;;  %5258 = vst [vmem:[#allocation47_spill] sm:$0xff] %v4148_v43  ;;  %v3154_v23 = vld [vmem:[%s5153_s2 + $0x2a4] sm:$0xf]  ;;  %v2412_v36 = vld [vmem:[%s5153_s2 + $0x218] sm:$0xf0] }
  0x52   :  { %810 = vmatpush.bf16.msrb.mxu2 %v4107_v53  ;;  %5259 = vst [vmem:[#allocation48_spill] sm:$0xff] %v4150_v61  ;;  %v4184_v53 = vor.u32 %v3106_v13, %v2292_v26  ;;  %v2284_v13 = vld [vmem:[%s5153_s2 + $0x118] sm:$0xf0]  ;;  %v3120_v26 = vld [vmem:[%s5153_s2 + $0x194] sm:$0xf]  ;;  %v4216_v41 = vor.u32 %v3154_v23, %v2484_v47 }
  0x53   :  { %798 = vmatpush.bf16.msra.mxu3 %v4125_v54  ;;  %5260 = vst [vmem:[#allocation49_spill] sm:$0xff] %v4162_v2  ;;  %v4186_v54 = vor.u32 %v3122_v51, %v2356_v4  ;;  %v2348_v51 = vld [vmem:[%s5153_s2 + $0x198] sm:$0xf0]  ;;  %v3136_v4 = vld [vmem:[%s5153_s2 + $0x214] sm:$0xf] }
  0x54   :  { %5261 = vst [vmem:[#allocation50_spill] sm:$0xff] %v4180_v10  ;;  %773 = vmatpush.bf16.msra.mxu0 %v4148_v43  ;;  %v2476_v43 = vld [vmem:[%s5153_s2 + $0x298] sm:$0xf0]  ;;  %v3102_v23 = vld [vmem:[%s5153_s2 + $0x104] sm:$0xf]  ;;  %v4234_v47 = vor.u32 %v3136_v4, %v2412_v36 }
  0x55   :  { %786 = vmatpush.bf16.msra.mxu1 %v4150_v61  ;;  %5262 = vst [vmem:[#allocation51_spill] sm:$0xff] %v4184_v53  ;;  %v3152_v61 = vld [vmem:[%s5153_s2 + $0x294] sm:$0xf]  ;;  %v2404_v4 = vld [vmem:[%s5153_s2 + $0x208] sm:$0xf0] }
  0x56   :  { %811 = vmatpush.bf16.msrb.mxu2 %v4144_v18  ;;  %5263 = vst [vmem:[#allocation52_spill] sm:$0xff] %v4186_v54  ;;  %v4220_v18 = vor.u32 %v3104_v52, %v2284_v13  ;;  %v2276_v52 = vld [vmem:[%s5153_s2 + $0x108] sm:$0xf0]  ;;  %v3118_v13 = vld [vmem:[%s5153_s2 + $0x184] sm:$0xf]  ;;  %v4252_v36 = vor.u32 %v3152_v61, %v2476_v43 }
  0x57   :  { %799 = vmatpush.bf16.msra.mxu3 %v4162_v2  ;;  %5264 = vst [vmem:[#allocation53_spill] sm:$0xff] %v4198_v63  ;;  %v4222_v2 = vor.u32 %v3120_v26, %v2348_v51  ;;  %v2340_v26 = vld [vmem:[%s5153_s2 + $0x188] sm:$0xf0]  ;;  %v3134_v51 = vld [vmem:[%s5153_s2 + $0x204] sm:$0xf] }
  0x58   :  { %5265 = vst [vmem:[#allocation54_spill] sm:$0xff] %v4216_v41  ;;  %774 = vmatpush.bf16.msra.mxu0 %v4184_v53  ;;  %v4264_v53 = vor.u32 %v3118_v13, %v2340_v26  ;;  %v3150_v43 = vld [vmem:[%s5153_s2 + $0x284] sm:$0xf]  ;;  %v2468_v61 = vld [vmem:[%s5153_s2 + $0x288] sm:$0xf0]  ;;  %v5302_v26 = vld [vmem:[#allocation34_spill] sm:$0xff] }
  0x59   :  { %787 = vmatpush.bf16.msra.mxu1 %v4186_v54  ;;  %v4262_v54 = vor.u32 %v3102_v23, %v2276_v52  ;;  %v4278_v23 = vor.u32 %v3150_v43, %v2468_v61  ;;  %v5301_v13 = vld [vmem:[#allocation40_spill] sm:$0xff]  ;;  %v5306_v61 = vld [vmem:[#allocation38_spill] sm:$0xff] }
  0x5a   :  { %812 = vmatpush.bf16.msrb.mxu2 %v4180_v10  ;;  %v3166_v10 = vld [vmem:[%s5153_s2 + $0x304] sm:$0xf]  ;;  %v5305_v43 = vld [vmem:[#allocation44_spill] sm:$0xff] }
  0x5b   :  { %800 = vmatpush.bf16.msra.mxu3 %v4198_v63  ;;  %v2532_v63 = vld [vmem:[%s5153_s2 + $0x308] sm:$0xf0] }
  0x5c   :  { %775 = vmatpush.bf16.msra.mxu0 %v4220_v18  ;;  %v4275_v0 = vor.u32 %v3166_v10, %v2532_v63 }
  0x5d   :  { %788 = vmatpush.bf16.msra.mxu1 %v4222_v2 }
  0x5e   :  { %813 = vmatpush.bf16.msrb.mxu2 %v4216_v41  ;;  %v4273_v41 = vor.u32 %v3134_v51, %v2404_v4  ;;  %v5303_v51 = vld [vmem:[#allocation41_spill] sm:$0xff]  ;;  %v5304_v4 = vld [vmem:[#allocation43_spill] sm:$0xff] }
  0x5f   :  { %801 = vmatpush.bf16.msra.mxu3 %v4234_v47 }
  0x60   :  { %776 = vmatpush.bf16.msra.mxu0 %v4262_v54 }
  0x61   :  { %789 = vmatpush.bf16.msra.mxu1 %v4264_v53 }
  0x62   :  { %814 = vmatpush.bf16.msrb.mxu2 %v4252_v36 }
  0x63   :  { %802 = vmatpush.bf16.msra.mxu3 %v4273_v41  ;;  %777 = vmatmul.bf16.vlgmr.msra.gmra.mxu0 %v3696_v28  ;;  %v5288_v28 = vld [vmem:[#allocation20_spill] sm:$0xff] }
  0x64   :  { %828 = vmatpush.bf16.msrb.mxu0 %v4275_v0  ;;  %790 = vmatmul.bf16.vlgmr.msra.gmra.mxu1 %v3701_v35  ;;  %v5289_v35 = vld [vmem:[#allocation28_spill] sm:$0xff] }
  0x65   :  { %861 = vmatpush.bf16.msrb.mxu1 %v3352_v3  ;;  %v838_v3 = vunpack.c.l.b16 %v3736_v55 }
  0x66   :  { %815 = vmatpush.bf16.msrb.mxu2 %v4278_v23  ;;  %803 = vmatmul.bf16.vlgmr.msra.gmra.mxu3 %v4006_v11 }
  0x67   :  { %874 = vmatpush.bf16.msrb.mxu3 %v3363_v7  ;;  %v839_v7 = vunpack.c.h.b16 %v3736_v55  ;;  %v5290_v55 = vld [vmem:[#allocation29_spill] sm:$0xff] }
  0x68   :  { %887 = vmatpush.bf16.msra.mxu0 %v3365_v8  ;;  %v841_v8 = vunpack.c.h.b16 %v3621_v42 }
  0x69   :  { %862 = vmatpush.bf16.msrb.mxu1 %v3390_v16  ;;  %816 = vmatmul.bf16.vlgmr.msrb.gmra.mxu2 %v4021_v15  ;;  %v4324_v16 = vpack.c.b16 %v839_v7, %v839_v7  ;;  %v5292_v15 = vld [vmem:[#allocation26_spill] sm:$0xff]  ;;  %v5308_v7 = vld [vmem:[#allocation47_spill] sm:$0xff] }
  0x6a   :  { %900 = vmatpush.bf16.msra.mxu2 %v3377_v12  ;;  %v4321_v12 = vpack.c.b16 %v838_v3, %v838_v3  ;;  %v5307_v3 = vld [vmem:[#allocation45_spill] sm:$0xff] }
  0x6b   :  { %875 = vmatpush.bf16.msrb.mxu3 %v3392_v17  ;;  %v840_v17 = vunpack.c.l.b16 %v3621_v42  ;;  %v5285_v42 = vld [vmem:[#allocation23_spill] sm:$0xff] }
  0x6c   :  { %888 = vmatpush.bf16.msra.mxu0 %v3404_v21  ;;  %v5266_v21 = vld [vmem:[#allocation5_spill] sm:$0xff] }
  0x6d   :  { %863 = vmatpush.bf16.msrb.mxu1 %v3427_v29  ;;  %v5267_v29 = vld [vmem:[#allocation4_spill] sm:$0xff] }
  0x6e   :  { %901 = vmatpush.bf16.msra.mxu2 %v3415_v25  ;;  %v4331_v25 = vpack.c.b16 %v841_v8, %v841_v8  ;;  %v5309_v8 = vld [vmem:[#allocation48_spill] sm:$0xff] }
  0x6f   :  { %876 = vmatpush.bf16.msrb.mxu3 %v3440_v33  ;;  %v5268_v33 = vld [vmem:[#allocation6_spill] sm:$0xff] }
  0x70   :  { %889 = vmatpush.bf16.msra.mxu0 %v3442_v34  ;;  %v4337_v34 = vpack.c.b16 %v840_v17, %v840_v17 }
  0x71   :  { %864 = vmatpush.bf16.msrb.mxu1 %v3472_v44  ;;  %v5270_v44 = vld [vmem:[#allocation3_spill] sm:$0xff] }
  0x72   :  { %902 = vmatpush.bf16.msra.mxu2 %v3454_v38  ;;  %v5269_v38 = vld [vmem:[#allocation9_spill] sm:$0xff] }
  0x73   :  { %877 = vmatpush.bf16.msrb.mxu3 %v3476_v45  ;;  %2537 = vmatmul.msk.bf16.vlgmr.msrb.gmra.mxu0 %vm648_vm0, %v3913_v19  ;;  %v5271_v45 = vld [vmem:[#allocation10_spill] sm:$0xff]  ;;  %v5291_v19 = vld [vmem:[#allocation25_spill] sm:$0xff] }
  0x74   :  { %890 = vmatpush.bf16.msra.mxu0 %v3478_v46  ;;  %v5272_v46 = vld [vmem:[#allocation7_spill] sm:$0xff]  ;;  %v842_v11 = vunpack.c.l.b16 %v5291_v19  ;;  %v843_v10 = vunpack.c.h.b16 %v5291_v19 }
  0x75   :  { %865 = vmatpush.bf16.msrb.mxu1 %v3508_v56  ;;  %v5274_v56 = vld [vmem:[#allocation13_spill] sm:$0xff]  ;;  %v2718_v19 = vld [vmem:[%s5155_s3 + $0x160] sm:$0xf] }
  0x76   :  { %903 = vmatpush.bf16.msra.mxu2 %v3490_v50  ;;  %v5273_v50 = vld [vmem:[#allocation11_spill] sm:$0xff]  ;;  %v4373_v63 = vpack.c.b16 %v842_v11, %v842_v11  ;;  %v4377_v52 = vpack.c.b16 %v843_v10, %v843_v10  ;;  %v3197_v10 = vld [vmem:[%s5155_s3 + $0xe4] sm:$0xf0] }
  0x77   :  { %878 = vmatpush.bf16.msrb.mxu3 %v3512_v57  ;;  %v5275_v57 = vld [vmem:[#allocation8_spill] sm:$0xff] }
  0x78   :  { %891 = vmatpush.bf16.msra.mxu0 %v3514_v58  ;;  %v5276_v58 = vld [vmem:[#allocation14_spill] sm:$0xff] }
  0x79   :  { %866 = vmatpush.bf16.msrb.mxu1 %v3544_v5  ;;  %v5278_v5 = vld [vmem:[#allocation17_spill] sm:$0xff] }
  0x7a   :  { %904 = vmatpush.bf16.msra.mxu2 %v3526_v62  ;;  %v5277_v62 = vld [vmem:[#allocation15_spill] sm:$0xff] }
  0x7b   :  { %879 = vmatpush.bf16.msrb.mxu3 %v3548_v6  ;;  %v5279_v6 = vld [vmem:[#allocation12_spill] sm:$0xff] }
  0x7c   :  { %892 = vmatpush.bf16.msra.mxu0 %v3550_v9  ;;  %v5280_v9 = vld [vmem:[#allocation18_spill] sm:$0xff] }
  0x7d   :  { %867 = vmatpush.bf16.msrb.mxu1 %v3583_v24 }
  0x7e   :  { %905 = vmatpush.bf16.msra.mxu2 %v3562_v14  ;;  %v5281_v14 = vld [vmem:[#allocation22_spill] sm:$0xff] }
  0x7f   :  { %880 = vmatpush.bf16.msrb.mxu3 %v3596_v30  ;;  %v844_v24 = vunpack.c.l.b16 %v5281_v14  ;;  %v5282_v30 = vld [vmem:[#allocation19_spill] sm:$0xff]  ;;  %v5316_v14 = vld [vmem:[#allocation50_spill] sm:$0xff] }
  0x80   :  { %893 = vmatpush.bf16.msra.mxu0 %v3598_v31  ;;  %v5283_v31 = vld [vmem:[#allocation21_spill] sm:$0xff] }
  0x81   :  { %868 = vmatpush.bf16.msrb.mxu1 %v3633_v49  ;;  %v5286_v49 = vld [vmem:[#allocation24_spill] sm:$0xff] }
  0x82   :  { %906 = vmatpush.bf16.msra.mxu2 %v3610_v37  ;;  %v5284_v37 = vld [vmem:[#allocation16_spill] sm:$0xff] }
  0x83   :  { %881 = vmatpush.bf16.msrb.mxu3 %v3648_v59  ;;  %v4359_v59 = vpack.c.b16 %v844_v24, %v844_v24  ;;  %v2726_v24 = vld [vmem:[%s5155_s3 + $0x170] sm:$0xf] }
  0x84   :  { %869 = vmatmul.bf16.vlgmr.msrb.gmra.mxu1 %v4321_v12  ;;  %894 = vmatpush.bf16.msra.mxu0 %v5270_v44  ;;  %v5311_v44 = vld [vmem:[#allocation49_spill] sm:$0xff] }
  0x85   :  { %913 = vmatpush.bf16.msra.mxu1 %v3661_v1  ;;  %v5287_v1 = vld [vmem:[#allocation27_spill] sm:$0xff] }
  0x86   :  { %907 = vmatpush.bf16.msra.mxu2 %v5267_v29  ;;  %882 = vmatmul.bf16.vlgmr.msrb.gmra.mxu3 %v4324_v16 }
  0x87   :  { %926 = vmatpush.bf16.msra.mxu3 %v5266_v21  ;;  %895 = vmatmul.bf16.vlgmr.msra.gmra.mxu0 %v4337_v34  ;;  %v5310_v21 = vld [vmem:[#allocation42_spill] sm:$0xff] }
  0x88   :  { %946 = vmatpush.bf16.msrb.mxu0 %v5272_v46  ;;  %v5312_v46 = vld [vmem:[#allocation51_spill] sm:$0xff] }
  0x89   :  { %914 = vmatpush.bf16.msra.mxu1 %v5269_v38  ;;  %908 = vmatmul.bf16.vlgmr.msra.gmra.mxu2 %v4331_v25 }
  0x8a   :  { %952 = vmatpush.bf16.msrb.mxu2 %v5268_v33 }
  0x8b   :  { %927 = vmatpush.bf16.msra.mxu3 %v5271_v45 }
  0x8c   :  { %965 = vmatpush.bf16.msra.mxu0 %v5275_v57 }
  0x8d   :  { %915 = vmatpush.bf16.msra.mxu1 %v5274_v56  ;;  %v5314_v56 = vld [vmem:[#allocation46_spill] sm:$0xff] }
  0x8e   :  { %953 = vmatpush.bf16.msrb.mxu2 %v5273_v50  ;;  %v5313_v50 = vld [vmem:[#allocation52_spill] sm:$0xff] }
  0x8f   :  { %928 = vmatpush.bf16.msra.mxu3 %v5276_v58  ;;  %v5315_v58 = vld [vmem:[#allocation53_spill] sm:$0xff] }
  0x90   :  { %966 = vmatpush.bf16.msra.mxu0 %v5279_v6  ;;  %v3183_v6 = vld [vmem:[%s5155_s3 + $0x74] sm:$0xf0] }
  0x91   :  { %916 = vmatpush.bf16.msra.mxu1 %v5278_v5  ;;  %v2598_v5 = vld [vmem:[%s5155_s3 + $0x70] sm:$0xf] }
  0x92   :  { %954 = vmatpush.bf16.msrb.mxu2 %v5277_v62 }
  0x93   :  { %929 = vmatpush.bf16.msra.mxu3 %v5280_v9 }
  0x94   :  { %967 = vmatpush.bf16.msra.mxu0 %v5284_v37  ;;  %v2599_v37 = vor.u32 %v3183_v6, %v2598_v5  ;;  %v3207_v5 = vld [vmem:[%s5155_s3 + $0x134] sm:$0xf0] }
  0x95   :  { %917 = vmatpush.bf16.msra.mxu1 %v5283_v31 }
  0x96   :  { %955 = vmatpush.bf16.msrb.mxu2 %v5282_v30  ;;  %v3215_v30 = vld [vmem:[%s5155_s3 + $0x174] sm:$0xf0] }
  0x97   :  { %930 = vmatpush.bf16.msra.mxu3 %v5285_v42  ;;  %2538 = vmatmul.msk.bf16.vlgmr.msrb.gmra.mxu0 %vm648_vm0, %v4359_v59 }
  0x98   :  { %968 = vmatpush.bf16.msra.mxu0 %v5288_v28  ;;  %v3181_v28 = vld [vmem:[%s5155_s3 + $0x64] sm:$0xf0] }
  0x99   :  { %918 = vmatpush.bf16.msra.mxu1 %v5287_v1  ;;  %v2590_v1 = vld [vmem:[%s5155_s3 + $0x60] sm:$0xf] }
  0x9a   :  { %956 = vmatpush.bf16.msrb.mxu2 %v5286_v49 }
  0x9b   :  { %931 = vmatpush.bf16.msra.mxu3 %v5289_v35  ;;  %v2727_v35 = vor.u32 %v3215_v30, %v2726_v24  ;;  %v2558_v24 = vld [vmem:[%s5155_s3 + $0x20] sm:$0xf]  ;;  %v2630_v30 = vld [vmem:[%s5155_s3 + $0xb0] sm:$0xf] }
  0x9c   :  { %969 = vmatpush.bf16.msra.mxu0 %v5292_v15  ;;  %v2591_v15 = vor.u32 %v3181_v28, %v2590_v1  ;;  %v2686_v28 = vld [vmem:[%s5155_s3 + $0x120] sm:$0xf] }
  0x9d   :  { %919 = vmatpush.bf16.msra.mxu1 %v3920_v32  ;;  %v5293_v32 = vld [vmem:[#allocation31_spill] sm:$0xff] }
  0x9e   :  { %957 = vmatpush.bf16.msrb.mxu2 %v5290_v55  ;;  %v5317_v55 = vld [vmem:[#allocation54_spill] sm:$0xff] }
  0x9f   :  { %932 = vmatpush.bf16.msra.mxu3 %v3934_v22  ;;  %v5294_v22 = vld [vmem:[#allocation32_spill] sm:$0xff] }
  0xa0   :  { %970 = vmatpush.bf16.msra.mxu0 %v3918_v27  ;;  %v5297_v27 = vld [vmem:[#allocation36_spill] sm:$0xff] }
  0xa1   :  { %920 = vmatpush.bf16.msra.mxu1 %v3971_v40  ;;  %v5296_v40 = vld [vmem:[#allocation30_spill] sm:$0xff] }
  0xa2   :  { %958 = vmatpush.bf16.msrb.mxu2 %v3936_v48  ;;  %v5295_v48 = vld [vmem:[#allocation35_spill] sm:$0xff] }
  0xa3   :  { %933 = vmatpush.bf16.msra.mxu3 %v3981_v20  ;;  %v5298_v20 = vld [vmem:[#allocation37_spill] sm:$0xff] }
  0xa4   :  { %921 = vmatmul.bf16.vlgmr.msra.gmra.mxu1 %v4373_v63  ;;  %971 = vmatpush.bf16.msra.mxu0 %v5296_v40  ;;  %v3211_v40 = vld [vmem:[%s5155_s3 + $0x154] sm:$0xf0] }
  0xa5   :  { %978 = vmatpush.bf16.msrb.mxu1 %v3991_v60  ;;  %v5299_v60 = vld [vmem:[#allocation39_spill] sm:$0xff]  ;;  %v674_v38 = vpop.f32.mrf.mxu1 }
  0xa6   :  { %959 = vmatpush.bf16.msrb.mxu2 %v5293_v32  ;;  %934 = vmatmul.bf16.vlgmr.msra.gmra.mxu3 %v4377_v52  ;;  %v661_v33 = vpop.f32.mrf.mxu0  ;;  %v2790_v32 = vld [vmem:[%s5155_s3 + $0x1f0] sm:$0xf] }
  0xa7   :  { %991 = vmatpush.bf16.msrb.mxu3 %v3993_v39  ;;  %v5300_v39 = vld [vmem:[#allocation33_spill] sm:$0xff]  ;;  %v675_v45 = vadd.f32 %v674_v38, %v661_v33  ;;  %v3193_v33 = vld [vmem:[%s5155_s3 + $0xc4] sm:$0xf0] }
  0xa8   :  { %972 = vmatpush.bf16.msra.mxu0 %v5300_v39  ;;  %v687_v17 = vpop.f32.mrf.mxu2  ;;  %v2574_v39 = vld [vmem:[%s5155_s3 + $0x40] sm:$0xf] }
  0xa9   :  { %979 = vmatpush.bf16.msrb.mxu1 %v5295_v48  ;;  %960 = vmatmul.bf16.vlgmr.msrb.gmra.mxu2 %v4321_v12  ;;  %v700_v29 = vpop.f32.mrf.mxu3  ;;  %v688_v57 = vadd.f32 %v687_v17, %v675_v45  ;;  %v2774_v45 = vld [vmem:[%s5155_s3 + $0x1d0] sm:$0xf] }
  0xaa   :  { %1004 = vmatpush.bf16.msra.mxu2 %v5294_v22  ;;  %v3231_v22 = vld [vmem:[%s5155_s3 + $0x1f4] sm:$0xf0] }
  0xab   :  { %992 = vmatpush.bf16.msrb.mxu3 %v5297_v27  ;;  %973 = vmatmul.bf16.vlgmr.msra.gmra.mxu0 %v4324_v16  ;;  %v4409_v62 = vadd.f32 %v700_v29, %v688_v57  ;;  %v2566_v29 = vld [vmem:[%s5155_s3 + $0x30] sm:$0xf] }
  0xac   :  { %1017 = vmatpush.bf16.msrb.mxu0 %v5302_v26  ;;  %v3177_v26 = vld [vmem:[%s5155_s3 + $0x44] sm:$0xf0] }
  0xad   :  { %980 = vmatpush.bf16.msrb.mxu1 %v5299_v60  ;;  %v676_v49 = vpop.f32.mrf.mxu1  ;;  %v2791_v60 = vor.u32 %v3231_v22, %v2790_v32  ;;  %v2575_v17 = vor.u32 %v3177_v26, %v2574_v39  ;;  %v3187_v26 = vld [vmem:[%s5155_s3 + $0x94] sm:$0xf0] }
  0xae   :  { %1005 = vmatpush.bf16.msra.mxu2 %v5298_v20  ;;  %v663_v42 = vpop.f32.mrf.mxu0  ;;  %v3225_v49 = vld [vmem:[%s5155_s3 + $0x1c4] sm:$0xf0] }
  0xaf   :  { %993 = vmatpush.bf16.msrb.mxu3 %v5301_v13  ;;  %v3195_v13 = vld [vmem:[%s5155_s3 + $0xd4] sm:$0xf0]  ;;  %v2766_v42 = vld [vmem:[%s5155_s3 + $0x1c0] sm:$0xf] }
  0xb0   :  { %1018 = vmatpush.bf16.msrb.mxu0 %v5306_v61  ;;  %v689_v9 = vpop.f32.mrf.mxu2 }
  0xb1   :  { %981 = vmatpush.bf16.msrb.mxu1 %v5304_v4  ;;  %v702_v31 = vpop.f32.mrf.mxu3  ;;  %v3229_v4 = vld [vmem:[%s5155_s3 + $0x1e4] sm:$0xf0] }
  0xb2   :  { %1006 = vmatpush.bf16.msra.mxu2 %v5303_v51  ;;  %v2782_v51 = vld [vmem:[%s5155_s3 + $0x1e0] sm:$0xf]  ;;  %v3191_v31 = vld [vmem:[%s5155_s3 + $0xb4] sm:$0xf0] }
  0xb3   :  { %994 = vmatpush.bf16.msrb.mxu3 %v5305_v43 }
  0xb4   :  { %1019 = vmatpush.bf16.msrb.mxu0 %v5310_v21  ;;  %v2783_v21 = vor.u32 %v3229_v4, %v2782_v51  ;;  %v3169_v51 = vld [vmem:[%s5155_s3 + $0x4] sm:$0xf0]  ;;  %v2750_v4 = vld [vmem:[%s5155_s3 + $0x1a0] sm:$0xf] }
  0xb5   :  { %982 = vmatpush.bf16.msrb.mxu1 %v5308_v7  ;;  %v3209_v7 = vld [vmem:[%s5155_s3 + $0x144] sm:$0xf0] }
  0xb6   :  { %1007 = vmatpush.bf16.msra.mxu2 %v5307_v3  ;;  %v2702_v3 = vld [vmem:[%s5155_s3 + $0x140] sm:$0xf] }
  0xb7   :  { %995 = vmatpush.bf16.msrb.mxu3 %v5309_v8  ;;  %v2703_v57 = vor.u32 %v3209_v7, %v2702_v3  ;;  %v2854_v3 = vld [vmem:[%s5155_s3 + $0x270] sm:$0xf]  ;;  %v3247_v7 = vld [vmem:[%s5155_s3 + $0x274] sm:$0xf0] }
  0xb8   :  { %1020 = vmatpush.bf16.msrb.mxu0 %v5314_v56 }
  0xb9   :  { %983 = vmatpush.bf16.msrb.mxu1 %v5312_v46  ;;  %v3227_v46 = vld [vmem:[%s5155_s3 + $0x1d4] sm:$0xf0] }
  0xba   :  { %1008 = vmatpush.bf16.msra.mxu2 %v5311_v44  ;;  %v3175_v44 = vld [vmem:[%s5155_s3 + $0x34] sm:$0xf0] }
  0xbb   :  { %996 = vmatpush.bf16.msrb.mxu3 %v5313_v50  ;;  %v739_v61 = vpop.f32.mrf.mxu2 }
  0xbc   :  { %1021 = vmatpush.bf16.msrb.mxu0 %v5316_v14  ;;  %v2567_v14 = vor.u32 %v3175_v44, %v2566_v29  ;;  %v2742_v29 = vld [vmem:[%s5155_s3 + $0x190] sm:$0xf] }
  0xbd   :  { %984 = vmatpush.bf16.msrb.mxu1 %v4220_v18  ;;  %v2662_v18 = vld [vmem:[%s5155_s3 + $0xf0] sm:$0xf] }
  0xbe   :  { %1009 = vmatpush.bf16.msra.mxu2 %v5315_v58  ;;  %v2694_v58 = vld [vmem:[%s5155_s3 + $0x130] sm:$0xf] }
  0xbf   :  { %997 = vmatpush.bf16.msrb.mxu3 %v4222_v2  ;;  %v3199_v2 = vld [vmem:[%s5155_s3 + $0xf4] sm:$0xf0] }
  0xc0   :  { %1022 = vmatpush.bf16.msrb.mxu0 %v5317_v55  ;;  %v2663_v11 = vor.u32 %v3199_v2, %v2662_v18  ;;  %v713_v38 = vpop.f32.mrf.mxu0  ;;  %v2695_v2 = vor.u32 %v3207_v5, %v2694_v58  ;;  %v2631_v55 = vor.u32 %v3191_v31, %v2630_v30  ;;  %v3219_v58 = vld [vmem:[%s5155_s3 + $0x194] sm:$0xf0]  ;;  %v2918_v5 = vld [vmem:[%s5155_s3 + $0x2f0] sm:$0xf]  ;;  %v3198_v31 = vld [vmem:[%s5155_s3 + $0xf4] sm:$0xf] }
  0xc1   :  { %985 = vmatpush.bf16.msrb.mxu1 %v4262_v54  ;;  %v2582_v54 = vld [vmem:[%s5155_s3 + $0x50] sm:$0xf]  ;;  %v714_v50 = vadd.f32 %v713_v38, %v4409_v62  ;;  %v726_v56 = vpop.f32.mrf.mxu1  ;;  %v2775_v62 = vor.u32 %v3227_v46, %v2774_v45  ;;  %v3265_v45 = vld [vmem:[%s5155_s3 + $0x304] sm:$0xf0] }
  0xc2   :  { %1010 = vmatpush.bf16.msra.mxu2 %v4234_v47  ;;  %v3213_v47 = vld [vmem:[%s5155_s3 + $0x164] sm:$0xf0] }
  0xc3   :  { %998 = vmatpush.bf16.msrb.mxu3 %v4264_v53  ;;  %v2654_v53 = vld [vmem:[%s5155_s3 + $0xe0] sm:$0xf]  ;;  %v2719_v48 = vor.u32 %v3213_v47, %v2718_v19  ;;  %v727_v9 = vadd.f32 %v726_v56, %v714_v50  ;;  %v741_v1 = vpop.f32.mrf.mxu2  ;;  %v2767_v47 = vor.u32 %v3225_v49, %v2766_v42  ;;  %v3185_v56 = vld [vmem:[%s5155_s3 + $0x84] sm:$0xf0]  ;;  %v2743_v49 = vor.u32 %v3219_v58, %v2742_v29  ;;  %v3239_v29 = vld [vmem:[%s5155_s3 + $0x234] sm:$0xf0] }
  0xc4   :  { %986 = vmatmul.bf16.vlgmr.msrb.gmra.mxu1 %v4337_v34  ;;  %1023 = vmatpush.bf16.msrb.mxu0 %v4252_v36  ;;  %v2655_v27 = vor.u32 %v3197_v10, %v2654_v53  ;;  %v2646_v36 = vld [vmem:[%s5155_s3 + $0xd0] sm:$0xf]  ;;  %v3171_v53 = vld [vmem:[%s5155_s3 + $0x14] sm:$0xf0]  ;;  %v2606_v50 = vld [vmem:[%s5155_s3 + $0x80] sm:$0xf] }
  0xc5   :  { %1037 = vmatpush.bf16.msra.mxu1 %v4275_v0  ;;  %v3179_v0 = vld [vmem:[%s5155_s3 + $0x54] sm:$0xf0]  ;;  %v2647_v8 = vor.u32 %v3195_v13, %v2646_v36  ;;  %v4547_v18 = vadd.f32 %v739_v61, %v727_v9  ;;  %v2758_v10 = vld [vmem:[%s5155_s3 + $0x1b0] sm:$0xf]  ;;  %v2542_v36 = vld [vmem:[%s5155_s3] sm:$0xf]  ;;  %v2607_v42 = vor.u32 %v3185_v56, %v2606_v50 }
  0xc6   :  { %1011 = vmatpush.bf16.msra.mxu2 %v4273_v41  ;;  %999 = vmatmul.bf16.vlgmr.msrb.gmra.mxu3 %v4331_v25  ;;  %v2710_v41 = vld [vmem:[%s5155_s3 + $0x150] sm:$0xf]  ;;  %v2583_v20 = vor.u32 %v3179_v0, %v2582_v54  ;;  %v3189_v54 = vld [vmem:[%s5155_s3 + $0xa4] sm:$0xf0]  ;;  %v3223_v0 = vld [vmem:[%s5155_s3 + $0x1b4] sm:$0xf0]  ;;  %v2543_v38 = vor.u32 %v3169_v51, %v2542_v36 }
  0xc7   :  { %1631 = vmatpush.bf16.msra.mxu3 %v2599_v37  ;;  %v2711_v43 = vor.u32 %v3211_v40, %v2710_v41  ;;  %v3173_v37 = vld [vmem:[%s5155_s3 + $0x24] sm:$0xf0]  ;;  %v2678_v40 = vld [vmem:[%s5155_s3 + $0x110] sm:$0xf]  ;;  %v2759_v39 = vor.u32 %v3223_v0, %v2758_v10  ;;  %v3196_v10 = vld [vmem:[%s5155_s3 + $0xe4] sm:$0xf] }
  0xc8   :  { %1024 = vmatpush.bf16.msrb.mxu0 %v4278_v23  ;;  %v2638_v23 = vld [vmem:[%s5155_s3 + $0xc0] sm:$0xf]  ;;  %v2559_v19 = vor.u32 %v3173_v37, %v2558_v24  ;;  %v715_v32 = vpop.f32.mrf.mxu0  ;;  %v2614_v13 = vld [vmem:[%s5155_s3 + $0x90] sm:$0xf]  ;;  %v3245_v24 = vld [vmem:[%s5155_s3 + $0x264] sm:$0xf0] }
  0xc9   :  { %1644 = vmatpush.bf16.msrb.mxu1 %v2663_v11  ;;  %1012 = vmatmul.bf16.vlgmr.msra.gmra.mxu2 %v4373_v63  ;;  %v2639_v6 = vor.u32 %v3193_v33, %v2638_v23  ;;  %v2550_v11 = vld [vmem:[%s5155_s3 + $0x10] sm:$0xf]  ;;  %v752_v22 = vpop.f32.mrf.mxu3  ;;  %v728_v41 = vpop.f32.mrf.mxu1  ;;  %v2926_v23 = vld [vmem:[%s5155_s3 + $0x300] sm:$0xf]  ;;  %v2664_v37 = vld [vmem:[%s5155_s3 + $0xf8] sm:$0xf0] }
  0xca   :  { %1657 = vmatpush.bf16.msrb.mxu2 %v2727_v35  ;;  %v3205_v35 = vld [vmem:[%s5155_s3 + $0x124] sm:$0xf0]  ;;  %v2927_v30 = vor.u32 %v3265_v45, %v2926_v23  ;;  %v2656_v0 = vld [vmem:[%s5155_s3 + $0xe8] sm:$0xf0]  ;;  %v3194_v51 = vld [vmem:[%s5155_s3 + $0xd4] sm:$0xf] }
  0xcb   :  { %1632 = vmatpush.bf16.msra.mxu3 %v2591_v15  ;;  %1025 = vmatmul.bf16.vlgmr.msrb.gmra.mxu0 %v4377_v52  ;;  %v2622_v15 = vld [vmem:[%s5155_s3 + $0xa0] sm:$0xf]  ;;  %v3241_v36 = vld [vmem:[%s5155_s3 + $0x244] sm:$0xf0]  ;;  %v3178_v23 = vld [vmem:[%s5155_s3 + $0x54] sm:$0xf] }
  0xcc   :  { %1670 = vmatpush.bf16.msra.mxu0 %v2791_v60  ;;  %v2551_v60 = vor.u32 %v3171_v53, %v2550_v11  ;;  %v765_v33 = vpop.f32.mrf.mxu2  ;;  %v2667_v11 = vor.u32 %v3198_v31, %v2664_v37  ;;  %v2600_v53 = vld [vmem:[%s5155_s3 + $0x78] sm:$0xf0]  ;;  %v2640_v45 = vld [vmem:[%s5155_s3 + $0xc8] sm:$0xf0]  ;;  %v3190_v31 = vld [vmem:[%s5155_s3 + $0xb4] sm:$0xf] }
  0xcd   :  { %1645 = vmatpush.bf16.msrb.mxu1 %v2655_v27  ;;  %v3203_v27 = vld [vmem:[%s5155_s3 + $0x114] sm:$0xf0]  ;;  %v4620_v46 = vadd.f32 %v765_v33, %v752_v22  ;;  %v2584_v33 = vld [vmem:[%s5155_s3 + $0x58] sm:$0xf0] }
  0xce   :  { %1658 = vmatpush.bf16.msrb.mxu2 %v2719_v48  ;;  %v2687_v48 = vor.u32 %v3205_v35, %v2686_v28  ;;  %v2679_v61 = vor.u32 %v3203_v27, %v2678_v40  ;;  %v2734_v28 = vld [vmem:[%s5155_s3 + $0x180] sm:$0xf]  ;;  %v2587_v58 = vor.u32 %v3178_v23, %v2584_v33  ;;  %v2632_v37 = vld [vmem:[%s5155_s3 + $0xb8] sm:$0xf0]  ;;  %v3170_v23 = vld [vmem:[%s5155_s3 + $0x14] sm:$0xf] }
  0xcf   :  { %1633 = vmatpush.bf16.msra.mxu3 %v2583_v20  ;;  %v2623_v20 = vor.u32 %v3189_v54, %v2622_v15  ;;  %v3243_v15 = vld [vmem:[%s5155_s3 + $0x254] sm:$0xf0]  ;;  %v3182_v54 = vld [vmem:[%s5155_s3 + $0x74] sm:$0xf]  ;;  %v2830_v27 = vld [vmem:[%s5155_s3 + $0x240] sm:$0xf] }
  0xd0   :  { %1671 = vmatpush.bf16.msra.mxu0 %v2783_v21  ;;  %v2615_v21 = vor.u32 %v3187_v26, %v2614_v13  ;;  %v2603_v40 = vor.u32 %v3182_v54, %v2600_v53  ;;  %v3180_v13 = vld [vmem:[%s5155_s3 + $0x64] sm:$0xf]  ;;  %v2592_v26 = vld [vmem:[%s5155_s3 + $0x68] sm:$0xf0]  ;;  %v2568_v54 = vld [vmem:[%s5155_s3 + $0x38] sm:$0xf0] }
  0xd1   :  { %1646 = vmatpush.bf16.msrb.mxu1 %v2647_v8  ;;  %v2670_v8 = vld [vmem:[%s5155_s3 + $0x100] sm:$0xf]  ;;  %v754_v9 = vpop.f32.mrf.mxu3 }
  0xd2   :  { %1659 = vmatpush.bf16.msrb.mxu2 %v2711_v43  ;;  %v3221_v43 = vld [vmem:[%s5155_s3 + $0x1a4] sm:$0xf0]  ;;  %v3255_v9 = vld [vmem:[%s5155_s3 + $0x2b4] sm:$0xf0]  ;;  %v2862_v33 = vld [vmem:[%s5155_s3 + $0x280] sm:$0xf] }
  0xd3   :  { %1634 = vmatpush.bf16.msra.mxu3 %v2575_v17  ;;  %v3201_v17 = vld [vmem:[%s5155_s3 + $0x104] sm:$0xf0]  ;;  %v2751_v44 = vor.u32 %v3221_v43, %v2750_v4  ;;  %v2648_v4 = vld [vmem:[%s5155_s3 + $0xd8] sm:$0xf0] }
  0xd4   :  { %1672 = vmatpush.bf16.msra.mxu0 %v2775_v62  ;;  %2539 = vmatmul.msk.bf16.vlgmr.msra.gmra.mxu1 %vm648_vm0, %v4359_v59  ;;  %v2846_v62 = vld [vmem:[%s5155_s3 + $0x260] sm:$0xf]  ;;  %v767_v32 = vpop.f32.mrf.mxu2 }
  0xd5   :  { %1647 = vmatpush.bf16.msrb.mxu1 %v2639_v6  ;;  %v3263_v6 = vld [vmem:[%s5155_s3 + $0x2f4] sm:$0xf0]  ;;  %v2847_v35 = vor.u32 %v3245_v24, %v2846_v62  ;;  %v3176_v62 = vld [vmem:[%s5155_s3 + $0x44] sm:$0xf]  ;;  %v2576_v24 = vld [vmem:[%s5155_s3 + $0x48] sm:$0xf0] }
  0xd6   :  { %1660 = vmatpush.bf16.msrb.mxu2 %v2703_v57  ;;  %v2855_v57 = vor.u32 %v3247_v7, %v2854_v3  ;;  %v2919_v1 = vor.u32 %v3263_v6, %v2918_v5  ;;  %v2595_v3 = vor.u32 %v3180_v13, %v2592_v26  ;;  %v2822_v7 = vld [vmem:[%s5155_s3 + $0x230] sm:$0xf]  ;;  %v2814_v5 = vld [vmem:[%s5155_s3 + $0x220] sm:$0xf]  ;;  %v2624_v32 = vld [vmem:[%s5155_s3 + $0xa8] sm:$0xf0] }
  0xd7   :  { %1635 = vmatpush.bf16.msra.mxu3 %v2567_v14  ;;  %v2671_v14 = vor.u32 %v3201_v17, %v2670_v8  ;;  %v2894_v8 = vld [vmem:[%s5155_s3 + $0x2c0] sm:$0xf]  ;;  %v3257_v17 = vld [vmem:[%s5155_s3 + $0x2c4] sm:$0xf0]  ;;  %v2886_v6 = vld [vmem:[%s5155_s3 + $0x2b0] sm:$0xf] }
  0xd8   :  { %1673 = vmatpush.bf16.msra.mxu0 %v2767_v47  ;;  %v3261_v47 = vld [vmem:[%s5155_s3 + $0x2e4] sm:$0xf0]  ;;  %v2895_v56 = vor.u32 %v3257_v17, %v2894_v8  ;;  %v3214_v26 = vld [vmem:[%s5155_s3 + $0x174] sm:$0xf] }
  0xd9   :  { %1648 = vmatpush.bf16.msrb.mxu1 %v2631_v55  ;;  %v3217_v55 = vld [vmem:[%s5155_s3 + $0x184] sm:$0xf0] }
  0xda   :  { %1661 = vmatpush.bf16.msrb.mxu2 %v2695_v2  ;;  %v2838_v2 = vld [vmem:[%s5155_s3 + $0x250] sm:$0xf]  ;;  %v2735_v22 = vor.u32 %v3217_v55, %v2734_v28  ;;  %v3253_v55 = vld [vmem:[%s5155_s3 + $0x2a4] sm:$0xf0] }
  0xdb   :  { %1636 = vmatpush.bf16.msra.mxu3 %v2559_v19  ;;  %v2910_v19 = vld [vmem:[%s5155_s3 + $0x2e0] sm:$0xf]  ;;  %v2839_v41 = vor.u32 %v3243_v15, %v2838_v2  ;;  %v2806_v28 = vld [vmem:[%s5155_s3 + $0x210] sm:$0xf]  ;;  %v3174_v15 = vld [vmem:[%s5155_s3 + $0x34] sm:$0xf] }
  0xdc   :  { %1674 = vmatpush.bf16.msra.mxu0 %v2759_v39  ;;  %v2659_v39 = vor.u32 %v3196_v10, %v2656_v0  ;;  %v3188_v0 = vld [vmem:[%s5155_s3 + $0xa4] sm:$0xf] }
  0xdd   :  { %1649 = vmatpush.bf16.msrb.mxu1 %v2623_v20  ;;  %v2902_v20 = vld [vmem:[%s5155_s3 + $0x2d0] sm:$0xf]  ;;  %v2627_v13 = vor.u32 %v3188_v0, %v2624_v32 }
  0xde   :  { %1662 = vmatpush.bf16.msrb.mxu2 %v2687_v48  ;;  %v2911_v48 = vor.u32 %v3261_v47, %v2910_v19  ;;  %v2635_v47 = vor.u32 %v3190_v31, %v2632_v37 }
  0xdf   :  { %1637 = vmatpush.bf16.msra.mxu3 %v2551_v60  ;;  %v3259_v60 = vld [vmem:[%s5155_s3 + $0x2d4] sm:$0xf0] }
  0xe0   :  { %1675 = vmatpush.bf16.msra.mxu0 %v2751_v44  ;;  %v2903_v43 = vor.u32 %v3259_v60, %v2902_v20  ;;  %v3192_v44 = vld [vmem:[%s5155_s3 + $0xc4] sm:$0xf]  ;;  %v2571_v20 = vor.u32 %v3174_v15, %v2568_v54  ;;  %v3233_v60 = vld [vmem:[%s5155_s3 + $0x204] sm:$0xf0]  ;;  %v3246_v15 = vld [vmem:[%s5155_s3 + $0x274] sm:$0xf] }
  0xe1   :  { %1650 = vmatpush.bf16.msrb.mxu1 %v2615_v21  ;;  %v2651_v21 = vor.u32 %v3194_v51, %v2648_v4  ;;  %v3172_v51 = vld [vmem:[%s5155_s3 + $0x24] sm:$0xf]  ;;  %v2560_v4 = vld [vmem:[%s5155_s3 + $0x28] sm:$0xf0]  ;;  %v2856_v54 = vld [vmem:[%s5155_s3 + $0x278] sm:$0xf0] }
  0xe2   :  { %1663 = vmatpush.bf16.msrb.mxu2 %v2679_v61  ;;  %v2831_v61 = vor.u32 %v3241_v36, %v2830_v27  ;;  %v3251_v36 = vld [vmem:[%s5155_s3 + $0x294] sm:$0xf0] }
  0xe3   :  { %1638 = vmatpush.bf16.msra.mxu3 %v2543_v38  ;;  %v778_v38 = vpop.f32.mrf.mxu0 }
  0xe4   :  { %1676 = vmatpush.bf16.msra.mxu0 %v2743_v49  ;;  %v779_v50 = vadd.f32 %v778_v38, %v4620_v46  ;;  %v2643_v46 = vor.u32 %v3192_v44, %v2640_v45  ;;  %v2887_v49 = vor.u32 %v3255_v9, %v2886_v6  ;;  %v3249_v38 = vld [vmem:[%s5155_s3 + $0x284] sm:$0xf0]  ;;  %v2720_v6 = vld [vmem:[%s5155_s3 + $0x168] sm:$0xf0]  ;;  %v3184_v9 = vld [vmem:[%s5155_s3 + $0x84] sm:$0xf] }
  0xe5   :  { %1651 = vmatpush.bf16.msrb.mxu1 %v2607_v42 }
  0xe6   :  { %1664 = vmatpush.bf16.msrb.mxu2 %v2671_v14  ;;  %1639 = vmatmul.bf16.vlgmr.msra.gmra.mxu3 %v4321_v12  ;;  %v3237_v14 = vld [vmem:[%s5155_s3 + $0x224] sm:$0xf0] }
  0xe7   :  { %1683 = vmatpush.bf16.msrb.mxu3 %v2855_v57  ;;  %v2823_v57 = vor.u32 %v3239_v29, %v2822_v7  ;;  %v2815_v2 = vor.u32 %v3237_v14, %v2814_v5  ;;  %v3212_v29 = vld [vmem:[%s5155_s3 + $0x164] sm:$0xf] }
  0xe8   :  { %1652 = vmatmul.bf16.vlgmr.msrb.gmra.mxu1 %v4324_v16  ;;  %1677 = vmatpush.bf16.msra.mxu0 %v2735_v22 }
  0xe9   :  { %1696 = vmatpush.bf16.msra.mxu1 %v2919_v1  ;;  %1665 = vmatmul.bf16.vlgmr.msrb.gmra.mxu2 %v4337_v34  ;;  %v2579_v1 = vor.u32 %v3176_v62, %v2576_v24  ;;  %v804_v19 = vpop.f32.mrf.mxu3  ;;  %v3262_v62 = vld [vmem:[%s5155_s3 + $0x2f4] sm:$0xf]  ;;  %v2920_v24 = vld [vmem:[%s5155_s3 + $0x2f8] sm:$0xf0] }
  0xea   :  { %1716 = vmatpush.bf16.msra.mxu2 %v2927_v30  ;;  %v791_v30 = vpop.f32.mrf.mxu1 }
  0xeb   :  { %1684 = vmatpush.bf16.msrb.mxu3 %v2847_v35  ;;  %1678 = vmatmul.bf16.vlgmr.msra.gmra.mxu0 %v4331_v25  ;;  %v792_v42 = vadd.f32 %v791_v30, %v779_v50  ;;  %v2878_v35 = vld [vmem:[%s5155_s3 + $0x2a0] sm:$0xf]  ;;  %v780_v53 = vpop.f32.mrf.mxu0  ;;  %v2552_v50 = vld [vmem:[%s5155_s3 + $0x18] sm:$0xf0]  ;;  %v2863_v30 = vor.u32 %v3249_v38, %v2862_v33  ;;  %v3256_v38 = vld [vmem:[%s5155_s3 + $0x2c4] sm:$0xf] }
  0xec   :  { %1722 = vmatpush.bf16.msrb.mxu0 %v2603_v40  ;;  %v817_v22 = vpop.f32.mrf.mxu2  ;;  %v2555_v37 = vor.u32 %v3170_v23, %v2552_v50  ;;  %v3260_v53 = vld [vmem:[%s5155_s3 + $0x2e4] sm:$0xf]  ;;  %v2840_v23 = vld [vmem:[%s5155_s3 + $0x258] sm:$0xf0] }
  0xed   :  { %1697 = vmatpush.bf16.msra.mxu1 %v2911_v48  ;;  %v805_v10 = vadd.f32 %v804_v19, %v792_v42  ;;  %v2798_v48 = vld [vmem:[%s5155_s3 + $0x200] sm:$0xf]  ;;  %v3210_v42 = vld [vmem:[%s5155_s3 + $0x154] sm:$0xf]  ;;  %v2784_v19 = vld [vmem:[%s5155_s3 + $0x1e8] sm:$0xf0] }
  0xee   :  { %1735 = vmatpush.bf16.msrb.mxu2 %v2667_v11  ;;  %v3235_v11 = vld [vmem:[%s5155_s3 + $0x214] sm:$0xf0]  ;;  %v2799_v17 = vor.u32 %v3233_v60, %v2798_v48  ;;  %v2859_v48 = vor.u32 %v3246_v15, %v2856_v54  ;;  %v2880_v15 = vld [vmem:[%s5155_s3 + $0x2a8] sm:$0xf0] }
  0xef   :  { %1685 = vmatpush.bf16.msrb.mxu3 %v2839_v41  ;;  %v2879_v41 = vor.u32 %v3253_v55, %v2878_v35  ;;  %v818_v40 = vadd.f32 %v817_v22, %v805_v10  ;;  %v2807_v27 = vor.u32 %v3235_v11, %v2806_v28  ;;  %v2544_v35 = vld [vmem:[%s5155_s3 + $0x8] sm:$0xf0]  ;;  %v3228_v55 = vld [vmem:[%s5155_s3 + $0x1e4] sm:$0xf]  ;;  %v2712_v11 = vld [vmem:[%s5155_s3 + $0x158] sm:$0xf0] }
  0xf0   :  { %1723 = vmatpush.bf16.msrb.mxu0 %v2595_v3  ;;  %v2616_v3 = vld [vmem:[%s5155_s3 + $0x98] sm:$0xf0]  ;;  %v2912_v10 = vld [vmem:[%s5155_s3 + $0x2e8] sm:$0xf0]  ;;  %v2787_v32 = vor.u32 %v3228_v55, %v2784_v19  ;;  %v2715_v22 = vor.u32 %v3210_v42, %v2712_v11  ;;  %v3202_v42 = vld [vmem:[%s5155_s3 + $0x114] sm:$0xf] }
  0xf1   :  { %1698 = vmatpush.bf16.msra.mxu1 %v2903_v43  ;;  %v2728_v43 = vld [vmem:[%s5155_s3 + $0x178] sm:$0xf0]  ;;  %v3238_v55 = vld [vmem:[%s5155_s3 + $0x234] sm:$0xf]  ;;  %v3252_v11 = vld [vmem:[%s5155_s3 + $0x2a4] sm:$0xf] }
  0xf2   :  { %1736 = vmatpush.bf16.msrb.mxu2 %v2659_v39  ;;  %v2870_v39 = vld [vmem:[%s5155_s3 + $0x290] sm:$0xf]  ;;  %v793_v7 = vpop.f32.mrf.mxu1  ;;  %v2731_v44 = vor.u32 %v3214_v26, %v2728_v43  ;;  %v3258_v26 = vld [vmem:[%s5155_s3 + $0x2d4] sm:$0xf]  ;;  %v2824_v19 = vld [vmem:[%s5155_s3 + $0x238] sm:$0xf0] }
  0xf3   :  { %1686 = vmatpush.bf16.msrb.mxu3 %v2831_v61  ;;  %v3186_v61 = vld [vmem:[%s5155_s3 + $0x94] sm:$0xf]  ;;  %v2871_v8 = vor.u32 %v3251_v36, %v2870_v39  ;;  %v830_v5 = vpop.f32.mrf.mxu0  ;;  %v2704_v39 = vld [vmem:[%s5155_s3 + $0x148] sm:$0xf0]  ;;  %v3244_v36 = vld [vmem:[%s5155_s3 + $0x264] sm:$0xf] }
  0xf4   :  { %1724 = vmatpush.bf16.msrb.mxu0 %v2587_v58  ;;  %v2619_v45 = vor.u32 %v3186_v61, %v2616_v3  ;;  %v806_v58 = vpop.f32.mrf.mxu3  ;;  %v4842_v14 = vadd.f32 %v830_v5, %v818_v40  ;;  %v819_v31 = vpop.f32.mrf.mxu2  ;;  %v3226_v40 = vld [vmem:[%s5155_s3 + $0x1d4] sm:$0xf]  ;;  %v3224_v7 = vld [vmem:[%s5155_s3 + $0x1c4] sm:$0xf] }
  0xf5   :  { %1699 = vmatpush.bf16.msra.mxu1 %v2895_v56  ;;  %v3230_v56 = vld [vmem:[%s5155_s3 + $0x1f4] sm:$0xf]  ;;  %v3204_v58 = vld [vmem:[%s5155_s3 + $0x124] sm:$0xf] }
  0xf6   :  { %1737 = vmatpush.bf16.msrb.mxu2 %v2651_v21  ;;  %v2563_v21 = vor.u32 %v3172_v51, %v2560_v4  ;;  %v2904_v51 = vld [vmem:[%s5155_s3 + $0x2d8] sm:$0xf0]  ;;  %v3206_v3 = vld [vmem:[%s5155_s3 + $0x134] sm:$0xf] }
  0xf7   :  { %1687 = vmatpush.bf16.msrb.mxu3 %v2823_v57  ;;  %v2792_v57 = vld [vmem:[%s5155_s3 + $0x1f8] sm:$0xf0]  ;;  %v3222_v5 = vld [vmem:[%s5155_s3 + $0x1b4] sm:$0xf] }
  0xf8   :  { %1725 = vmatpush.bf16.msrb.mxu0 %v2579_v1  ;;  %v2723_v1 = vor.u32 %v3212_v29, %v2720_v6  ;;  %v3242_v29 = vld [vmem:[%s5155_s3 + $0x254] sm:$0xf]  ;;  %v3240_v6 = vld [vmem:[%s5155_s3 + $0x244] sm:$0xf] }
  0xf9   :  { %1700 = vmatpush.bf16.msra.mxu1 %v2887_v49  ;;  %2932 = vmatmul.msk.bf16.vlgmr.msra.gmra.mxu2 %vm648_vm0, %v4359_v59  ;;  %v2795_v49 = vor.u32 %v3230_v56, %v2792_v57  ;;  %v2843_v57 = vor.u32 %v3242_v29, %v2840_v23  ;;  %v3234_v23 = vld [vmem:[%s5155_s3 + $0x214] sm:$0xf] }
  0xfa   :  { %1738 = vmatpush.bf16.msrb.mxu2 %v2643_v46  ;;  %v2608_v46 = vld [vmem:[%s5155_s3 + $0x88] sm:$0xf0] }
  0xfb   :  { %1688 = vmatpush.bf16.msrb.mxu3 %v2815_v2  ;;  %v3168_v2 = vld [vmem:[%s5155_s3 + $0x4] sm:$0xf]  ;;  %v2611_v28 = vor.u32 %v3184_v9, %v2608_v46  ;;  %v832_v60 = vpop.f32.mrf.mxu0  ;;  %v2832_v9 = vld [vmem:[%s5155_s3 + $0x248] sm:$0xf0]  ;;  %v3254_v46 = vld [vmem:[%s5155_s3 + $0x2b4] sm:$0xf] }
  0xfc   :  { %1726 = vmatpush.bf16.msrb.mxu0 %v2571_v20  ;;  %v2547_v0 = vor.u32 %v3168_v2, %v2544_v35  ;;  %v2915_v20 = vor.u32 %v3260_v53, %v2912_v10  ;;  %v2752_v2 = vld [vmem:[%s5155_s3 + $0x1a8] sm:$0xf0]  ;;  %v2680_v35 = vld [vmem:[%s5155_s3 + $0x118] sm:$0xf0]  ;;  %v3200_v10 = vld [vmem:[%s5155_s3 + $0x104] sm:$0xf] }
  0xfd   :  { %1701 = vmatpush.bf16.msra.mxu1 %v2879_v41  ;;  %v3208_v41 = vld [vmem:[%s5155_s3 + $0x144] sm:$0xf] }
  0xfe   :  { %1739 = vmatpush.bf16.msrb.mxu2 %v2635_v47  ;;  %v2923_v47 = vor.u32 %v3262_v62, %v2920_v24  ;;  %v2707_v43 = vor.u32 %v3208_v41, %v2704_v39  ;;  %v2888_v62 = vld [vmem:[%s5155_s3 + $0x2b8] sm:$0xf0]  ;;  %v2672_v41 = vld [vmem:[%s5155_s3 + $0x108] sm:$0xf0]  ;;  %v3236_v60 = vld [vmem:[%s5155_s3 + $0x224] sm:$0xf] }
  0xff   :  { %1689 = vmatpush.bf16.msrb.mxu3 %v2807_v27  ;;  %v2776_v27 = vld [vmem:[%s5155_s3 + $0x1d8] sm:$0xf0]  ;;  %v2816_v39 = vld [vmem:[%s5155_s3 + $0x228] sm:$0xf0] }
 0x100   :  { %1727 = vmatpush.bf16.msrb.mxu0 %v2563_v21  ;;  %v2779_v4 = vor.u32 %v3226_v40, %v2776_v27  ;;  %v2696_v21 = vld [vmem:[%s5155_s3 + $0x138] sm:$0xf0]  ;;  %v3218_v40 = vld [vmem:[%s5155_s3 + $0x194] sm:$0xf] }
 0x101   :  { %1702 = vmatpush.bf16.msra.mxu1 %v2871_v8  ;;  %v2768_v8 = vld [vmem:[%s5155_s3 + $0x1c8] sm:$0xf0]  ;;  %v870_v33 = vpop.f32.mrf.mxu1  ;;  %v2699_v56 = vor.u32 %v3206_v3, %v2696_v21  ;;  %v2744_v27 = vld [vmem:[%s5155_s3 + $0x198] sm:$0xf0]  ;;  %v2675_v3 = vor.u32 %v3200_v10, %v2672_v41 }
 0x102   :  { %1740 = vmatpush.bf16.msrb.mxu2 %v2627_v13  ;;  %v2848_v13 = vld [vmem:[%s5155_s3 + $0x268] sm:$0xf0]  ;;  %v2771_v50 = vor.u32 %v3224_v7, %v2768_v8  ;;  %v2819_v7 = vor.u32 %v3236_v60, %v2816_v39  ;;  %v3216_v8 = vld [vmem:[%s5155_s3 + $0x184] sm:$0xf]  ;;  %v3285_v39 = vld [vmem:[%s5156_s5 + $0x18] sm:$0xff] }
 0x103   :  { %1690 = vmatpush.bf16.msrb.mxu3 %v2799_v17  ;;  %v2851_v61 = vor.u32 %v3244_v36, %v2848_v13  ;;  %v2907_v17 = vor.u32 %v3258_v26, %v2904_v51  ;;  %v3250_v36 = vld [vmem:[%s5155_s3 + $0x294] sm:$0xf]  ;;  %v2872_v26 = vld [vmem:[%s5155_s3 + $0x298] sm:$0xf0]  ;;  %v3264_v51 = vld [vmem:[%s5155_s3 + $0x304] sm:$0xf] }
 0x104   :  { %1728 = vmatpush.bf16.msrb.mxu0 %v2555_v37  ;;  %v896_v24 = vpop.f32.mrf.mxu0  ;;  %v2835_v37 = vor.u32 %v3240_v6, %v2832_v9  ;;  %v2875_v21 = vor.u32 %v3250_v36, %v2872_v26  ;;  %v3269_v36 = vld [vmem:[%s5157_s4 + $0x18] sm:$0xff]  ;;  %v3268_v26 = vld [vmem:[%s5157_s4 + $0x10] sm:$0xff] }
 0x105   :  { %1703 = vmatpush.bf16.msra.mxu1 %v2863_v30 }
 0x106   :  { %1741 = vmatpush.bf16.msrb.mxu2 %v2619_v45  ;;  %1691 = vmatmul.bf16.vlgmr.msrb.gmra.mxu3 %v4373_v63  ;;  %v871_v45 = vadd.f32 %v870_v33, %v4547_v18  ;;  %v2688_v18 = vld [vmem:[%s5155_s3 + $0x128] sm:$0xf0]  ;;  %v2808_v33 = vld [vmem:[%s5155_s3 + $0x218] sm:$0xf0] }
 0x107   :  { %1748 = vmatpush.bf16.msra.mxu3 %v2731_v44  ;;  %v2896_v44 = vld [vmem:[%s5155_s3 + $0x2c8] sm:$0xf0]  ;;  %v2691_v31 = vor.u32 %v3204_v58, %v2688_v18 }
 0x108   :  { %1704 = vmatmul.bf16.vlgmr.msra.gmra.mxu1 %v4377_v52  ;;  %1729 = vmatpush.bf16.msrb.mxu0 %v2547_v0 }
 0x109   :  { %1761 = vmatpush.bf16.msrb.mxu1 %v2795_v49  ;;  %v3220_v49 = vld [vmem:[%s5155_s3 + $0x1a4] sm:$0xf]  ;;  %v872_v54 = vpop.f32.mrf.mxu1 }
 0x10a   :  { %1742 = vmatpush.bf16.msrb.mxu2 %v2611_v28  ;;  %v2891_v28 = vor.u32 %v3254_v46, %v2888_v62  ;;  %v2755_v0 = vor.u32 %v3220_v49, %v2752_v2  ;;  %v3288_v54 = vld [vmem:[%s5156_s5 + $0x30] sm:$0xff] }
 0x10b   :  { %1749 = vmatpush.bf16.msra.mxu3 %v2723_v1  ;;  %1730 = vmatmul.bf16.vlgmr.msrb.gmra.mxu0 %v4321_v12  ;;  %v2760_v12 = vld [vmem:[%s5155_s3 + $0x1b8] sm:$0xf0]  ;;  %v883_v1 = vpop.f32.mrf.mxu3 }
 0x10c   :  { %1774 = vmatpush.bf16.msra.mxu0 %v2859_v48  ;;  %v2763_v30 = vor.u32 %v3222_v5, %v2760_v12  ;;  %v909_v53 = vpop.f32.mrf.mxu2  ;;  %v2827_v48 = vor.u32 %v3238_v55, %v2824_v19  ;;  %v3232_v5 = vld [vmem:[%s5155_s3 + $0x204] sm:$0xf]  ;;  %v2800_v12 = vld [vmem:[%s5155_s3 + $0x208] sm:$0xf0] }
 0x10d   :  { %1762 = vmatpush.bf16.msrb.mxu1 %v2787_v32  ;;  %1743 = vmatmul.bf16.vlgmr.msrb.gmra.mxu2 %v4324_v16  ;;  %v2899_v16 = vor.u32 %v3256_v38, %v2896_v44  ;;  %v3248_v44 = vld [vmem:[%s5155_s3 + $0x284] sm:$0xf]  ;;  %v2803_v18 = vor.u32 %v3232_v5, %v2800_v12  ;;  %v3295_v5 = vld [vmem:[%s5156_s5 + $0x68] sm:$0xff] }
 0x10e   :  { %1787 = vmatpush.bf16.msra.mxu2 %v2923_v47  ;;  %v884_v47 = vadd.f32 %v883_v1, %v871_v45  ;;  %v2864_v45 = vld [vmem:[%s5155_s3 + $0x288] sm:$0xf0] }
 0x10f   :  { %1750 = vmatpush.bf16.msra.mxu3 %v2715_v22  ;;  %v2683_v22 = vor.u32 %v3202_v42, %v2680_v35  ;;  %v2867_v58 = vor.u32 %v3248_v44, %v2864_v45  ;;  %v3296_v44 = vld [vmem:[%s5156_s5 + $0x70] sm:$0xff]  ;;  %v3279_v12 = vld [vmem:[%s5157_s4 + $0x68] sm:$0xff] }
 0x110   :  { %1775 = vmatpush.bf16.msra.mxu0 %v2851_v61  ;;  %v897_v32 = vadd.f32 %v896_v24, %v884_v47  ;;  %v2747_v61 = vor.u32 %v3218_v40, %v2744_v27  ;;  %v3286_v27 = vld [vmem:[%s5156_s5 + $0x20] sm:$0xff]  ;;  %v3280_v45 = vld [vmem:[%s5157_s4 + $0x70] sm:$0xff] }
 0x111   :  { %1763 = vmatpush.bf16.msrb.mxu1 %v2779_v4  ;;  %v2928_v4 = vld [vmem:[%s5155_s3 + $0x308] sm:$0xf0] }
 0x112   :  { %1788 = vmatpush.bf16.msra.mxu2 %v2915_v20  ;;  %v2883_v20 = vor.u32 %v3252_v11, %v2880_v15  ;;  %v910_v13 = vadd.f32 %v909_v53, %v897_v32  ;;  %v2931_v29 = vor.u32 %v3264_v51, %v2928_v4  ;;  %v3272_v53 = vld [vmem:[%s5157_s4 + $0x30] sm:$0xff]  ;;  %v3287_v32 = vld [vmem:[%s5156_s5 + $0x28] sm:$0xff] }
 0x113   :  { %1751 = vmatpush.bf16.msra.mxu3 %v2707_v43  ;;  %v898_v43 = vpop.f32.mrf.mxu0  ;;  %v885_v38 = vpop.f32.mrf.mxu3  ;;  %v3283_v4 = vld [vmem:[%s5156_s5 + $0x8] sm:$0xff] }
 0x114   :  { %1776 = vmatpush.bf16.msra.mxu0 %v2843_v57  ;;  %v2811_v57 = vor.u32 %v3234_v23, %v2808_v33  ;;  %v3267_v43 = vld [vmem:[%s5157_s4 + $0x8] sm:$0xff]  ;;  %v3281_v23 = vld [vmem:[%s5157_s4 + $0x78] sm:$0xff] }
 0x115   :  { %1764 = vmatpush.bf16.msrb.mxu1 %v2771_v50 }
 0x116   :  { %1789 = vmatpush.bf16.msra.mxu2 %v2907_v17  ;;  %v2736_v17 = vld [vmem:[%s5155_s3 + $0x188] sm:$0xf0] }
 0x117   :  { %1752 = vmatpush.bf16.msra.mxu3 %v2699_v56  ;;  %v2739_v50 = vor.u32 %v3216_v8, %v2736_v17  ;;  %v911_v56 = vpop.f32.mrf.mxu2  ;;  %v3282_v8 = vld [vmem:[%s5156_s5] sm:$0xff] }
 0x118   :  { %1777 = vmatpush.bf16.msra.mxu0 %v2835_v37  ;;  %v3266_v17 = vld [vmem:[%s5157_s4] sm:$0xff] }
 0x119   :  { %1765 = vmatpush.bf16.msrb.mxu1 %v2763_v30 }
 0x11a   :  { %1790 = vmatpush.bf16.msra.mxu2 %v2899_v16 }
 0x11b   :  { %1753 = vmatpush.bf16.msra.mxu3 %v2691_v31  ;;  %v948_v16 = vpop.f32.mrf.mxu0 }
 0x11c   :  { %1778 = vmatpush.bf16.msra.mxu0 %v2827_v48 }
 0x11d   :  { %1766 = vmatpush.bf16.msrb.mxu1 %v2755_v0 }
 0x11e   :  { %1791 = vmatpush.bf16.msra.mxu2 %v2891_v28  ;;  %v3289_v28 = vld [vmem:[%s5156_s5 + $0x38] sm:$0xff] }
 0x11f   :  { %1754 = vmatpush.bf16.msra.mxu3 %v2683_v22  ;;  %v3271_v22 = vld [vmem:[%s5157_s4 + $0x28] sm:$0xff] }
 0x120   :  { %1779 = vmatpush.bf16.msra.mxu0 %v2819_v7 }
 0x121   :  { %1767 = vmatpush.bf16.msrb.mxu1 %v2747_v61  ;;  %v922_v6 = vpop.f32.mrf.mxu1 }
 0x122   :  { %1792 = vmatpush.bf16.msra.mxu2 %v2883_v20  ;;  %v923_v46 = vadd.f32 %v922_v6, %v910_v13  ;;  %v3270_v20 = vld [vmem:[%s5157_s4 + $0x20] sm:$0xff]  ;;  %v3284_v13 = vld [vmem:[%s5156_s5 + $0x10] sm:$0xff] }
 0x123   :  { %1755 = vmatpush.bf16.msra.mxu3 %v2675_v3  ;;  %v950_v9 = vpop.f32.mrf.mxu0 }
 0x124   :  { %1780 = vmatpush.bf16.msra.mxu0 %v2811_v57  ;;  %v3294_v9 = vld [vmem:[%s5156_s5 + $0x60] sm:$0xff] }
 0x125   :  { %1768 = vmatpush.bf16.msrb.mxu1 %v2739_v50 }
 0x126   :  { %1793 = vmatpush.bf16.msra.mxu2 %v2875_v21  ;;  %1756 = vmatmul.bf16.vlgmr.msra.gmra.mxu3 %v4337_v34 }
 0x127   :  { %1807 = vmatpush.bf16.msrb.mxu3 %v2931_v29  ;;  %v3297_v29 = vld [vmem:[%s5156_s5 + $0x78] sm:$0xff] }
 0x128   :  { %1769 = vmatmul.bf16.vlgmr.msrb.gmra.mxu1 %v4331_v25  ;;  %1781 = vmatpush.bf16.msra.mxu0 %v2803_v18 }
 0x129   :  { %v935_v62 = vpop.f32.mrf.mxu3  ;;  %v924_v34 = vpop.f32.mrf.mxu1  ;;  %1983 = vmatpush.bf16.msra.mxu1 %v3289_v28 }
 0x12a   :  { %1794 = vmatpush.bf16.msra.mxu2 %v2867_v58  ;;  %v936_v24 = vadd.f32 %v935_v62, %v923_v46  ;;  %v3278_v46 = vld [vmem:[%s5157_s4 + $0x60] sm:$0xff] }
 0x12b   :  { %1782 = vmatmul.bf16.vlgmr.msra.gmra.mxu0 %v4373_v63  ;;  %v974_v31 = vpop.f32.mrf.mxu0  ;;  %1996 = vmatpush.bf16.msra.mxu3 %v3297_v29  ;;  %v3300_v29 = vld [vmem:[%s5159_s6] ss:$0 sm:$0xff] }
 0x12c   :  { %v961_v30 = vpop.f32.mrf.mxu2  ;;  %v5041_v37 = vadd.f32 %v948_v16, %v936_v24 }
 0x12d   :  { %1795 = vmatmul.bf16.vlgmr.msra.gmra.mxu2 %v4377_v52  ;;  %v962_v25 = vadd.f32 %v961_v30, %v4842_v14  ;;  %1984 = vmatpush.bf16.msra.mxu1 %v3288_v54 }
 0x12e   :  { %2118 = vmatpush.bf16.msrb.mxu2 %v3281_v23 }
 0x12f   :  { %v975_v42 = vadd.f32 %v974_v31, %v962_v25  ;;  %1997 = vmatpush.bf16.msra.mxu3 %v3296_v44  ;;  %v3293_v31 = vld [vmem:[%s5156_s5 + $0x58] sm:$0xff]  ;;  %v3302_v44 = vmov 0.0  }
 0x130   :  { %v3277_v25 = vld [vmem:[%s5157_s4 + $0x58] sm:$0xff] }
 0x131   :  { %v937_v52 = vpop.f32.mrf.mxu3  ;;  %1985 = vmatpush.bf16.msra.mxu1 %v3287_v32 }
 0x132   :  { %2119 = vmatpush.bf16.msrb.mxu2 %v3280_v45 }
 0x133   :  { %v976_v2 = vpop.f32.mrf.mxu0  ;;  %1998 = vmatpush.bf16.msra.mxu3 %v3295_v5 }
 0x134   :  { %v963_v49 = vpop.f32.mrf.mxu2 }
 0x135   :  { %1986 = vmatpush.bf16.msra.mxu1 %v3286_v27  ;;  %v1816_v49 = vstv %s5158_s0 }
 0x136   :  { %2933 = vmatmul.msk.bf16.vlgmr.msrb.gmra.mxu3 %vm648_vm0, %v4359_v59  ;;  %v3273_v59 = vld [vmem:[%s5157_s4 + $0x38] sm:$0xff]  ;;  %2120 = vmatpush.bf16.msrb.mxu2 %v3279_v12 }
 0x137   :  { %2105 = vmatpush.bf16.msrb.mxu0 %v3273_v59  ;;  %1999 = vmatpush.bf16.msra.mxu3 %v3294_v9 }
 0x139   :  { %1987 = vmatpush.bf16.msra.mxu1 %v3285_v39 }
 0x13a   :  { %2121 = vmatpush.bf16.msrb.mxu2 %v3278_v46 }
 0x13b   :  { %2106 = vmatpush.bf16.msrb.mxu0 %v3272_v53  ;;  %2000 = vmatpush.bf16.msra.mxu3 %v3293_v31 }
 0x13d   :  { %1988 = vmatpush.bf16.msra.mxu1 %v3284_v13 }
 0x13e   :  { %2122 = vmatpush.bf16.msrb.mxu2 %v3277_v25 }
 0x13f   :  { %2107 = vmatpush.bf16.msrb.mxu0 %v3271_v22 }
 0x141   :  { %v987_v1 = vpop.f32.mrf.mxu1  ;;  %1989 = vmatpush.bf16.msra.mxu1 %v3283_v4 }
 0x142   :  { %v988_v63 = vadd.f32 %v987_v1, %v975_v42  ;;  %v3292_v1 = vld [vmem:[%s5156_s5 + $0x50] sm:$0xff] }
 0x143   :  { %2108 = vmatpush.bf16.msrb.mxu0 %v3270_v20  ;;  %2001 = vmatpush.bf16.msra.mxu3 %v3292_v1 }
 0x145   :  { %1990 = vmatpush.bf16.msra.mxu1 %v3282_v8 }
 0x147   :  { %2109 = vmatpush.bf16.msrb.mxu0 %v3269_v36 }
 0x148   :  { %v1026_v47 = vpop.f32.mrf.mxu0 }
 0x149   :  { %v1000_v35 = vpop.f32.mrf.mxu3  ;;  %v989_v19 = vpop.f32.mrf.mxu1 }
 0x14a   :  { %v1001_v55 = vadd.f32 %v1000_v35, %v988_v63  ;;  %v3276_v63 = vld [vmem:[%s5157_s4 + $0x50] sm:$0xff]  ;;  %v3275_v19 = vld [vmem:[%s5157_s4 + $0x48] sm:$0xff] }
 0x14b   :  { %2110 = vmatpush.bf16.msrb.mxu0 %v3268_v26  ;;  %2123 = vmatpush.bf16.msrb.mxu2 %v3276_v63 }
 0x14c   :  { %v1013_v14 = vpop.f32.mrf.mxu2 }
 0x14d   :  { %v1014_v11 = vadd.f32 %v1013_v14, %v1001_v55  ;;  %v3301_v55 = vmov 1.0|1.0   ;;  %v3290_v14 = vld [vmem:[%s5156_s5 + $0x40] sm:$0xff] }
 0x14f   :  { %v1027_v15 = vadd.f32 %v1026_v47, %v1014_v11  ;;  %2111 = vmatpush.bf16.msrb.mxu0 %v3267_v43  ;;  %2124 = vmatpush.bf16.msrb.mxu2 %v3275_v19  ;;  %v3274_v47 = vld [vmem:[%s5157_s4 + $0x40] sm:$0xff] }
 0x150   :  { %v1028_v40 = vpop.f32.mrf.mxu0 }
 0x151   :  { %v1002_v10 = vpop.f32.mrf.mxu3  ;;  %v1039_v0 = vpop.f32.mrf.mxu1 }
 0x152   :  { %v5062_v48 = vadd.f32 %v1039_v0, %v1027_v15 }
 0x153   :  { %2112 = vmatpush.bf16.msrb.mxu0 %v3266_v17  ;;  %2125 = vmatpush.bf16.msrb.mxu2 %v3274_v47 }
 0x154   :  { %v1015_v41 = vpop.f32.mrf.mxu2 }
 0x159   :  { %v1041_v60 = vpop.f32.mrf.mxu1 }
 0x165   :  { %v1653_v51 = vpop.f32.mrf.mxu1 }
 0x168   :  { %v1679_v3 = vpop.f32.mrf.mxu0 }
 0x169   :  { %v1640_v7 = vpop.f32.mrf.mxu3 }
 0x16a   :  { %v1654_v56 = vadd.f32 %v1653_v51, %v1640_v7 }
 0x16c   :  { %v1666_v61 = vpop.f32.mrf.mxu2 }
 0x16d   :  { %v1655_v21 = vpop.f32.mrf.mxu1  ;;  %v1667_v58 = vadd.f32 %v1666_v61, %v1654_v56 }
 0x16f   :  { %v1680_v18 = vadd.f32 %v1679_v3, %v1667_v58 }
 0x170   :  { %v1681_v38 = vpop.f32.mrf.mxu0 }
 0x171   :  { %v1642_v50 = vpop.f32.mrf.mxu3 }
 0x174   :  { %v1668_v33 = vpop.f32.mrf.mxu2 }
 0x17c   :  { %v1718_v57 = vpop.f32.mrf.mxu2 }
 0x184   :  { %v1720_v6 = vpop.f32.mrf.mxu2 }
 0x185   :  { %v1705_v16 = vpop.f32.mrf.mxu1 }
 0x188   :  { %v1731_v34 = vpop.f32.mrf.mxu0 }
 0x189   :  { %v1692_v62 = vpop.f32.mrf.mxu3 }
 0x18a   :  { %v1693_v24 = vadd.f32 %v1692_v62, %v1680_v18 }
 0x18c   :  { %v1706_v30 = vadd.f32 %v1705_v16, %v1693_v24 }
 0x18d   :  { %v1707_v52 = vpop.f32.mrf.mxu1 }
 0x18e   :  { %v1719_v42 = vadd.f32 %v1718_v57, %v1706_v30 }
 0x190   :  { %v1813_v2 = vadd.f32 %v1719_v42, %v5041_v37  ;;  %v1744_v59 = vpop.f32.mrf.mxu2  ;;  %v1733_v35 = vpop.f32.mrf.mxu0  ;;  %v3291_v37 = vld [vmem:[%s5156_s5 + $0x48] sm:$0xff] }
 0x191   :  { %v1694_v28 = vpop.f32.mrf.mxu3  ;;  %2002 = vmatpush.bf16.msra.mxu3 %v3291_v37  ;;  %v1745_v53 = vadd.f32 %v1744_v59, %v1731_v34 }
 0x192   :  { %vm1817_vm1 = vcmp.ge.f32.partialorder %v1813_v2, %v1816_v49 }
 0x193   :  { %vm2998_vm2 = vmpackc.low %vm1817_vm1, %vm1817_vm1 }
 0x194   :  { %2999 = vmatmul.msk.bf16.vlgmr.msra.gmra.mxu1 %vm2998_vm2, %v3301_v55  ;;  %3067 = vmatmul.msk.bf16.vlgmr.msrb.gmra.mxu0 %vm2998_vm2, %v3301_v55 }
 0x195   :  { %2003 = vmatpush.bf16.msra.mxu3 %v3290_v14 }
 0x198   :  { %v1746_v11 = vpop.f32.mrf.mxu2 }
 0x1a5   :  { %v1770_v15 = vpop.f32.mrf.mxu1 }
 0x1a8   :  { %v1783_v10 = vpop.f32.mrf.mxu0 }
 0x1a9   :  { %v1757_v54 = vpop.f32.mrf.mxu3 }
 0x1aa   :  { %v1758_v0 = vadd.f32 %v1757_v54, %v1745_v53 }
 0x1ac   :  { %v1771_v41 = vadd.f32 %v1770_v15, %v1758_v0 }
 0x1ad   :  { %v1772_v22 = vpop.f32.mrf.mxu1 }
 0x1ae   :  { %v1784_v20 = vadd.f32 %v1783_v10, %v1771_v41 }
 0x1b0   :  { %v1796_v32 = vpop.f32.mrf.mxu2  ;;  %v1785_v27 = vpop.f32.mrf.mxu0 }
 0x1b1   :  { %v1759_v40 = vpop.f32.mrf.mxu3  ;;  %v1797_v39 = vadd.f32 %v1796_v32, %v1784_v20 }
 0x1b8   :  { %v1798_v60 = vpop.f32.mrf.mxu2 }
 0x1b9   :  { %v1809_v36 = vpop.f32.mrf.mxu3 }
 0x1ba   :  { %v1810_v13 = vadd.f32 %v1809_v36, %v1797_v39 }
 0x1bc   :  { %v1814_v26 = vadd.f32 %v1810_v13, %v5062_v48 }
 0x1be   :  { %vm1818_vm3 = vcmp.ge.f32.partialorder %v1814_v26, %v1816_v49 }
 0x1bf   :  { %vm3000_vm4 = vmpackc.low %vm1818_vm3, %vm1818_vm3 }
 0x1c0   :  { %3001 = vmatmul.msk.bf16.vlgmr.msra.gmra.mxu3 %vm3000_vm4, %v3301_v55  ;;  %3069 = vmatmul.msk.bf16.vlgmr.msrb.gmra.mxu2 %vm3000_vm4, %v3301_v55 }
 0x1c1   :  { %v1811_v51 = vpop.f32.mrf.mxu3 }
 0x211   :  { %v1992_v4 = vpop.f32.mrf.mxu1  ;;  %v2114_v43 = vpop.f32.mrf.mxu0 }
 0x219   :  { %v1994_v61 = vpop.f32.mrf.mxu1  ;;  %v2116_v3 = vpop.f32.mrf.mxu0 }
 0x243   :  { %v2005_v7 = vpop.f32.mrf.mxu3  ;;  %v2127_v8 = vpop.f32.mrf.mxu2 }
 0x244   :  { %v2006_v17 = vadd.f32 %v2005_v7, %v1992_v4 }
 0x246   :  { %v2115_v21 = vadd.f32 %v2114_v43, %v2006_v17 }
 0x248   :  { %v2128_v23 = vadd.f32 %v2127_v8, %v2115_v21 }
 0x24a   :  { %v2135_v33 = vadd.f32 %v3300_v29, %v2128_v23 }
 0x24b   :  { %v2007_v48 = vpop.f32.mrf.mxu3  ;;  %v2129_v38 = vpop.f32.mrf.mxu2 }
 0x24c   :  { %vm2136_vm5 = vcmp.ge.f32.partialorder %v2135_v33, 2.0 }
 0x24d   :  { %v2137_v45 = vsel %vm2136_vm5, 1.0, %v3302_v44 }
 0x24e   :  { %v2138_v50 = vpack.c.bf16 %v2137_v45, %v2137_v45 }
 0x250   :  { %2139 = vst [vmem:[%s5160_s7] sm:$0xf] %v2138_v50 }

</bundles_post_ra>
